<compile_context>
chip_gen: v7x
topology: tpu7x:2x2x1
jax: 0.10.0
libtpu: 0.0.40
codegen_flags: <defaults>
</compile_context>

<pallas_src>
import jax
import jax.numpy as jnp
from jax import lax
from jax.experimental import pallas as pl
from jax.experimental.pallas import tpu as pltpu

# ----------------------------- model config ---------------------------------
B = 2          # batch
S = 8          # sequence length
H = 32         # hidden size
NH = 2         # attention heads
HD = H // NH   # head dim
F = 64         # FFN intermediate size
LAYERS = 2     # encoder layers
VOCAB = 100
MAX_POS = 32
TYPE_VOCAB = 2
LN_EPS = 1e-12

_MXU = jnp.bfloat16                      # operand dtype at the MXU; accum f32
_VMEM = pl.BlockSpec(memory_space=pltpu.MemorySpace.VMEM)


# ----------------------------- kernel helpers --------------------------------
def _layernorm(x, g, b):
    mu = jnp.mean(x, axis=-1, keepdims=True)
    var = jnp.mean((x - mu) ** 2, axis=-1, keepdims=True)
    return (x - mu) * lax.rsqrt(var + LN_EPS) * g + b


def _gelu(x):
    # tanh approximation (BERT-style GELU), f32, EUP tanh.
    return 0.5 * x * (1.0 + jnp.tanh(0.7978845608028654 * (x + 0.044715 * x * x * x)))


# ----------------------------- fused Pallas kernel ---------------------------
def fused_bert_kernel(ids_ref, wemb_ref, pemb_ref, temb_ref,
                      eln_g_ref, eln_b_ref,
                      wqkv_ref, bqkv_ref, wo_ref, bo_ref,
                      ln1_g_ref, ln1_b_ref,
                      w1_ref, b1_ref, w2_ref, b2_ref,
                      ln2_g_ref, ln2_b_ref,
                      pw_ref, pb_ref,
                      out_ref):
    T = B * S

    # ---- fused embedding lookup (one-hot matmul; no dynamic indexing) -------
    ids = ids_ref[...]                                              # (T,1) int32
    vocab_iota = lax.broadcasted_iota(jnp.int32, (T, VOCAB), 1)
    onehot = (ids == vocab_iota).astype(jnp.float32)                # (T,VOCAB)
    word = jnp.dot(onehot, wemb_ref[...],
                   preferred_element_type=jnp.float32)              # (T,H)
    pos = jnp.broadcast_to(pemb_ref[0:S, :][None], (B, S, H)).reshape(T, H)
    typ = temb_ref[0:1, :]                                          # token_type_ids == 0
    x = _layernorm(word + pos + typ, eln_g_ref[...], eln_b_ref[...])  # (T,H) f32

    # ---- hoisted attention constants: per-head lane masks, scale folded in --
    lane = lax.broadcasted_iota(jnp.int32, (NH, 1, 1, H), 3)
    head = lax.broadcasted_iota(jnp.int32, (NH, 1, 1, H), 0)
    mask = ((lane >= head * HD) & (lane < (head + 1) * HD)).astype(jnp.float32)
    mask_scaled = mask * (1.0 / (HD ** 0.5))                        # (NH,1,1,H)

    # Static loop over encoder layers; weights are stacked [LAYERS, ...] and
    # indexed with a static int -> activation stays resident in vregs/VMEM.
    for l in range(LAYERS):
        # Fused QKV projection on the flat (T,H) activation: one [H,3H] matmul.
        qkv = jnp.dot(x.astype(_MXU), wqkv_ref[l],
                      preferred_element_type=jnp.float32) + bqkv_ref[l]   # (T,3H)
        q = qkv[:, 0:H].reshape(B, S, H)
        k = qkv[:, H:2 * H].reshape(B, S, H)
        v = qkv[:, 2 * H:3 * H].reshape(B, S, H)

        # All heads at once: masked Q keeps each head's contraction in its own
        # lane range, masked V keeps each head's context in its own lanes, so
        # the sum over the head axis reproduces the concatenated context.
        qm = (q[None] * mask_scaled).reshape(NH * B, S, H)
        vm = (v[None] * mask).reshape(NH * B, S, H)
        kb = jnp.broadcast_to(k[None], (NH, B, S, H)).reshape(NH * B, S, H)

        s = jnp.einsum('zqe,zke->zqk', qm.astype(_MXU), kb.astype(_MXU),
                       preferred_element_type=jnp.float32)          # (NH*B,S,S)
        s = s - jnp.max(s, axis=-1, keepdims=True)
        p = jnp.exp(s)
        p = p * pl.reciprocal(jnp.sum(p, axis=-1, keepdims=True), approx=True)
        ctx = jnp.einsum('zqk,zke->zqe', p.astype(_MXU), vm.astype(_MXU),
                         preferred_element_type=jnp.float32)        # (NH*B,S,H)
        ctx = ctx.reshape(NH, B, S, H).sum(axis=0).reshape(T, H)    # (T,H)

        attn = jnp.dot(ctx.astype(_MXU), wo_ref[l],
                       preferred_element_type=jnp.float32) + bo_ref[l]
        h1 = _layernorm(x + attn, ln1_g_ref[l], ln1_b_ref[l])

        ff = _gelu(jnp.dot(h1.astype(_MXU), w1_ref[l],
                           preferred_element_type=jnp.float32) + b1_ref[l])
        ff = jnp.dot(ff.astype(_MXU), w2_ref[l],
                     preferred_element_type=jnp.float32) + b2_ref[l]
        x = _layernorm(h1 + ff, ln2_g_ref[l], ln2_b_ref[l])

    # ---- both outputs from the single pass, one lane-contiguous store -------
    x3 = x.reshape(B, S, H)
    sum_feats = jnp.sum(x3, axis=1)                                 # outputs[0].sum(1)
    cls = x3[:, 0, :]                                               # [CLS] hidden
    cls_feats = jnp.tanh(jnp.dot(cls.astype(_MXU), pw_ref[...],
                                 preferred_element_type=jnp.float32) + pb_ref[...])
    out_ref[...] = jnp.concatenate([sum_feats, cls_feats], axis=-1)  # (B, 2H)


_fused_forward = pl.pallas_call(
    fused_bert_kernel,
    out_shape=jax.ShapeDtypeStruct((B, 2 * H), jnp.float32),
    in_specs=[_VMEM] * 20,
    out_specs=_VMEM,
)


# ----------------------------- parameter init --------------------------------
def init_params(key):
    def nrm(k, shape, scale=0.02, dtype=jnp.float32):
        return (scale * jax.random.normal(k, shape)).astype(dtype)

    ks = jax.random.split(key, 8)
    return {
        'word_emb': nrm(ks[0], (VOCAB, H)),
        'pos_emb': nrm(ks[1], (MAX_POS, H)),
        'type_emb': nrm(ks[2], (TYPE_VOCAB, H)),
        'emb_ln_g': jnp.ones((1, H), jnp.float32),
        'emb_ln_b': jnp.zeros((1, H), jnp.float32),
        # stacked per-layer weights; matmul weights pre-cast to bf16 on host.
        'wqkv': nrm(ks[3], (LAYERS, H, 3 * H), dtype=jnp.bfloat16),
        'bqkv': jnp.zeros((LAYERS, 1, 3 * H), jnp.float32),
        'wo': nrm(ks[4], (LAYERS, H, H), dtype=jnp.bfloat16),
        'bo': jnp.zeros((LAYERS, 1, H), jnp.float32),
        'ln1_g': jnp.ones((LAYERS, 1, H), jnp.float32),
        'ln1_b': jnp.zeros((LAYERS, 1, H), jnp.float32),
        'w1': nrm(ks[5], (LAYERS, H, F), dtype=jnp.bfloat16),
        'b1': jnp.zeros((LAYERS, 1, F), jnp.float32),
        'w2': nrm(ks[6], (LAYERS, F, H), dtype=jnp.bfloat16),
        'b2': jnp.zeros((LAYERS, 1, H), jnp.float32),
        'ln2_g': jnp.ones((LAYERS, 1, H), jnp.float32),
        'ln2_b': jnp.zeros((LAYERS, 1, H), jnp.float32),
        'pooler_w': nrm(ks[7], (H, H), dtype=jnp.bfloat16),
        'pooler_b': jnp.zeros((1, H), jnp.float32),
    }


# ----------------------------- forward (module equivalent) -------------------
@jax.jit
def mme2e_t_zh_forward_both(params, input_ids):
    """input_ids: int32 [B, S].  Returns (text_features, cls_features)."""
    ids = input_ids.reshape(B * S, 1).astype(jnp.int32)
    out = _fused_forward(
        ids, params['word_emb'], params['pos_emb'], params['type_emb'],
        params['emb_ln_g'], params['emb_ln_b'],
        params['wqkv'], params['bqkv'], params['wo'], params['bo'],
        params['ln1_g'], params['ln1_b'],
        params['w1'], params['b1'], params['w2'], params['b2'],
        params['ln2_g'], params['ln2_b'],
        params['pooler_w'], params['pooler_b'])
    return out[:, :H], out[:, H:]


def mme2e_t_zh_forward(params, input_ids, get_cls=False):
    text_features, cls_features = mme2e_t_zh_forward_both(params, input_ids)
    return cls_features if get_cls else text_features


# ----------------------------- main ------------------------------------------
if __name__ == "__main__":
    key = jax.random.PRNGKey(0)
    k_params, k_ids = jax.random.split(key)
    params = init_params(k_params)
    input_ids = jax.random.randint(k_ids, (B, S), 0, VOCAB, dtype=jnp.int32)

    # One fused pass produces BOTH outputs (text sum-features and CLS pooler).
    text_features, cls_features = mme2e_t_zh_forward_both(params, input_ids)

    jax.block_until_ready(text_features)
    jax.block_until_ready(cls_features)

    assert text_features.shape == (B, H)
    assert cls_features.shape == (B, H)
    assert bool(jnp.all(jnp.isfinite(text_features)))
    assert bool(jnp.all(jnp.isfinite(cls_features)))
    print("KERNEL_OK")
</pallas_src>

<mosaic_0001>
module attributes {stable_mosaic.version = 11 : i64} {
  func.func @fused_bert_kernel(%arg0: memref<16x1xi32, #tpu.memory_space<vmem>>, %arg1: memref<100x32xf32, #tpu.memory_space<vmem>>, %arg2: memref<32x32xf32, #tpu.memory_space<vmem>>, %arg3: memref<2x32xf32, #tpu.memory_space<vmem>>, %arg4: memref<1x32xf32, #tpu.memory_space<vmem>>, %arg5: memref<1x32xf32, #tpu.memory_space<vmem>>, %arg6: memref<2x32x96xbf16, #tpu.memory_space<vmem>>, %arg7: memref<2x1x96xf32, #tpu.memory_space<vmem>>, %arg8: memref<2x32x32xbf16, #tpu.memory_space<vmem>>, %arg9: memref<2x1x32xf32, #tpu.memory_space<vmem>>, %arg10: memref<2x1x32xf32, #tpu.memory_space<vmem>>, %arg11: memref<2x1x32xf32, #tpu.memory_space<vmem>>, %arg12: memref<2x32x64xbf16, #tpu.memory_space<vmem>>, %arg13: memref<2x1x64xf32, #tpu.memory_space<vmem>>, %arg14: memref<2x64x32xbf16, #tpu.memory_space<vmem>>, %arg15: memref<2x1x32xf32, #tpu.memory_space<vmem>>, %arg16: memref<2x1x32xf32, #tpu.memory_space<vmem>>, %arg17: memref<2x1x32xf32, #tpu.memory_space<vmem>>, %arg18: memref<32x32xbf16, #tpu.memory_space<vmem>>, %arg19: memref<1x32xf32, #tpu.memory_space<vmem>>, %arg20: memref<2x64xf32, #tpu.memory_space<vmem>>) attributes {dimension_semantics = [], scalar_prefetch = 0 : i64, scratch_operands = 0 : i64, tpu.core_type = #tpu.core_type<tc>} {
    %c0 = arith.constant 0 : index
    %c0_0 = arith.constant 0 : index
    %0 = vector.load %arg0[%c0, %c0_0] : memref<16x1xi32, #tpu.memory_space<vmem>>, vector<16x1xi32>
    %1 = tpu.iota {dimensions = array<i32: 1>} : vector<16x100xi32>
    %2 = vector.broadcast %0 : vector<16x1xi32> to vector<16x100xi32>
    %3 = arith.cmpi eq, %2, %1 : vector<16x100xi32>
    %4 = arith.extui %3 : vector<16x100xi1> to vector<16x100xi32>
    %5 = arith.sitofp %4 : vector<16x100xi32> to vector<16x100xf32>
    %c0_1 = arith.constant 0 : index
    %c0_2 = arith.constant 0 : index
    %6 = vector.load %arg1[%c0_1, %c0_2] : memref<100x32xf32, #tpu.memory_space<vmem>>, vector<100x32xf32>
    %cst = arith.constant dense<0.000000e+00> : vector<16x32xf32>
    %7 = tpu.matmul %5, %6, %cst {dimension_numbers = #tpu.dot_dimension_numbers<[1], [0], [0], [1], [0, 0, 1, 1], [], []>} : vector<16x100xf32>, vector<100x32xf32>, vector<16x32xf32> -> vector<16x32xf32>
    %c0_3 = arith.constant 0 : index
    %c0_4 = arith.constant 0 : index
    %8 = vector.load %arg2[%c0_3, %c0_4] : memref<32x32xf32, #tpu.memory_space<vmem>>, vector<8x32xf32>
    %9 = vector.shape_cast %8 : vector<8x32xf32> to vector<1x8x32xf32>
    %10 = vector.shape_cast %9 : vector<1x8x32xf32> to vector<1x8x32xf32>
    %11 = vector.broadcast %10 : vector<1x8x32xf32> to vector<2x8x32xf32>
    %12 = vector.shape_cast %11 : vector<2x8x32xf32> to vector<16x32xf32>
    %c0_5 = arith.constant 0 : index
    %c0_6 = arith.constant 0 : index
    %13 = vector.load %arg3[%c0_5, %c0_6] : memref<2x32xf32, #tpu.memory_space<vmem>>, vector<1x32xf32>
    %14 = arith.addf %7, %12 : vector<16x32xf32>
    %15 = vector.broadcast %13 : vector<1x32xf32> to vector<16x32xf32>
    %16 = arith.addf %14, %15 : vector<16x32xf32>
    %c0_7 = arith.constant 0 : index
    %c0_8 = arith.constant 0 : index
    %17 = vector.load %arg4[%c0_7, %c0_8] : memref<1x32xf32, #tpu.memory_space<vmem>>, vector<1x32xf32>
    %c0_9 = arith.constant 0 : index
    %c0_10 = arith.constant 0 : index
    %18 = vector.load %arg5[%c0_9, %c0_10] : memref<1x32xf32, #tpu.memory_space<vmem>>, vector<1x32xf32>
    %cst_11 = arith.constant dense<0.000000e+00> : vector<16xf32>
    %19 = vector.multi_reduction <add>, %16, %cst_11 [1] : vector<16x32xf32> to vector<16xf32>
    %20 = vector.shape_cast %19 : vector<16xf32> to vector<16x1xf32>
    %cst_12 = arith.constant 3.200000e+01 : f32
    %21 = vector.broadcast %cst_12 : f32 to vector<16x1xf32>
    %22 = arith.divf %20, %21 : vector<16x1xf32>
    %23 = vector.broadcast %22 : vector<16x1xf32> to vector<16x32xf32>
    %24 = arith.subf %16, %23 : vector<16x32xf32>
    %25 = arith.mulf %24, %24 : vector<16x32xf32>
    %cst_13 = arith.constant dense<0.000000e+00> : vector<16xf32>
    %26 = vector.multi_reduction <add>, %25, %cst_13 [1] : vector<16x32xf32> to vector<16xf32>
    %27 = vector.shape_cast %26 : vector<16xf32> to vector<16x1xf32>
    %cst_14 = arith.constant 3.200000e+01 : f32
    %28 = vector.broadcast %cst_14 : f32 to vector<16x1xf32>
    %29 = arith.divf %27, %28 : vector<16x1xf32>
    %30 = vector.broadcast %22 : vector<16x1xf32> to vector<16x32xf32>
    %31 = arith.subf %16, %30 : vector<16x32xf32>
    %cst_15 = arith.constant 9.99999996E-13 : f32
    %32 = vector.broadcast %cst_15 : f32 to vector<16x1xf32>
    %33 = arith.addf %29, %32 : vector<16x1xf32>
    %34 = math.rsqrt %33 : vector<16x1xf32>
    %35 = vector.broadcast %34 : vector<16x1xf32> to vector<16x32xf32>
    %36 = arith.mulf %31, %35 : vector<16x32xf32>
    %37 = vector.broadcast %17 : vector<1x32xf32> to vector<16x32xf32>
    %38 = arith.mulf %36, %37 : vector<16x32xf32>
    %39 = vector.broadcast %18 : vector<1x32xf32> to vector<16x32xf32>
    %40 = arith.addf %38, %39 : vector<16x32xf32>
    %41 = tpu.iota {dimensions = array<i32: 3>} : vector<2x1x1x32xi32>
    %42 = tpu.iota {dimensions = array<i32: 0>} : vector<2x1x1x32xi32>
    %c16_i32 = arith.constant 16 : i32
    %43 = vector.broadcast %c16_i32 : i32 to vector<2x1x1x32xi32>
    %44 = arith.muli %42, %43 : vector<2x1x1x32xi32>
    %45 = arith.cmpi sge, %41, %44 : vector<2x1x1x32xi32>
    %c1_i32 = arith.constant 1 : i32
    %46 = vector.broadcast %c1_i32 : i32 to vector<2x1x1x32xi32>
    %47 = arith.addi %42, %46 : vector<2x1x1x32xi32>
    %c16_i32_16 = arith.constant 16 : i32
    %48 = vector.broadcast %c16_i32_16 : i32 to vector<2x1x1x32xi32>
    %49 = arith.muli %47, %48 : vector<2x1x1x32xi32>
    %50 = arith.cmpi slt, %41, %49 : vector<2x1x1x32xi32>
    %51 = arith.andi %45, %50 : vector<2x1x1x32xi1>
    %52 = arith.extui %51 : vector<2x1x1x32xi1> to vector<2x1x1x32xi32>
    %53 = arith.sitofp %52 : vector<2x1x1x32xi32> to vector<2x1x1x32xf32>
    %cst_17 = arith.constant 2.500000e-01 : f32
    %54 = vector.broadcast %cst_17 : f32 to vector<2x1x1x32xf32>
    %55 = arith.mulf %53, %54 : vector<2x1x1x32xf32>
    %56 = arith.truncf %40 : vector<16x32xf32> to vector<16x32xbf16>
    %c0_18 = arith.constant 0 : index
    %c0_19 = arith.constant 0 : index
    %c0_20 = arith.constant 0 : index
    %57 = vector.load %arg6[%c0_18, %c0_19, %c0_20] : memref<2x32x96xbf16, #tpu.memory_space<vmem>>, vector<1x32x96xbf16>
    %58 = vector.shape_cast %57 : vector<1x32x96xbf16> to vector<32x96xbf16>
    %cst_21 = arith.constant dense<0.000000e+00> : vector<16x96xf32>
    %59 = tpu.matmul %56, %58, %cst_21 {dimension_numbers = #tpu.dot_dimension_numbers<[1], [0], [0], [1], [0, 0, 1, 1], [], []>} : vector<16x32xbf16>, vector<32x96xbf16>, vector<16x96xf32> -> vector<16x96xf32>
    %c0_22 = arith.constant 0 : index
    %c0_23 = arith.constant 0 : index
    %c0_24 = arith.constant 0 : index
    %60 = vector.load %arg7[%c0_22, %c0_23, %c0_24] : memref<2x1x96xf32, #tpu.memory_space<vmem>>, vector<1x1x96xf32>
    %61 = vector.shape_cast %60 : vector<1x1x96xf32> to vector<1x96xf32>
    %62 = vector.broadcast %61 : vector<1x96xf32> to vector<16x96xf32>
    %63 = arith.addf %59, %62 : vector<16x96xf32>
    %64 = vector.extract_strided_slice %63 {offsets = [0, 0], sizes = [16, 32], strides = [1, 1]} : vector<16x96xf32> to vector<16x32xf32>
    %65 = vector.shape_cast %64 : vector<16x32xf32> to vector<2x8x32xf32>
    %66 = vector.extract_strided_slice %63 {offsets = [0, 32], sizes = [16, 32], strides = [1, 1]} : vector<16x96xf32> to vector<16x32xf32>
    %67 = vector.shape_cast %66 : vector<16x32xf32> to vector<2x8x32xf32>
    %68 = vector.extract_strided_slice %63 {offsets = [0, 64], sizes = [16, 32], strides = [1, 1]} : vector<16x96xf32> to vector<16x32xf32>
    %69 = vector.shape_cast %68 : vector<16x32xf32> to vector<2x8x32xf32>
    %70 = vector.shape_cast %65 : vector<2x8x32xf32> to vector<1x2x8x32xf32>
    %71 = vector.broadcast %70 : vector<1x2x8x32xf32> to vector<2x2x8x32xf32>
    %72 = vector.broadcast %55 : vector<2x1x1x32xf32> to vector<2x2x8x32xf32>
    %73 = arith.mulf %71, %72 : vector<2x2x8x32xf32>
    %74 = vector.shape_cast %73 : vector<2x2x8x32xf32> to vector<4x8x32xf32>
    %75 = vector.shape_cast %69 : vector<2x8x32xf32> to vector<1x2x8x32xf32>
    %76 = vector.broadcast %75 : vector<1x2x8x32xf32> to vector<2x2x8x32xf32>
    %77 = vector.broadcast %53 : vector<2x1x1x32xf32> to vector<2x2x8x32xf32>
    %78 = arith.mulf %76, %77 : vector<2x2x8x32xf32>
    %79 = vector.shape_cast %78 : vector<2x2x8x32xf32> to vector<4x8x32xf32>
    %80 = vector.shape_cast %67 : vector<2x8x32xf32> to vector<1x2x8x32xf32>
    %81 = vector.shape_cast %80 : vector<1x2x8x32xf32> to vector<1x2x8x32xf32>
    %82 = vector.broadcast %81 : vector<1x2x8x32xf32> to vector<2x2x8x32xf32>
    %83 = vector.shape_cast %82 : vector<2x2x8x32xf32> to vector<4x8x32xf32>
    %84 = arith.truncf %74 : vector<4x8x32xf32> to vector<4x8x32xbf16>
    %85 = arith.truncf %83 : vector<4x8x32xf32> to vector<4x8x32xbf16>
    "tpu.trace_start"() <{level = 10 : i32, message = "zqe,zke->zqk"}> : () -> ()
    %cst_25 = arith.constant dense<0.000000e+00> : vector<4x8x8xf32>
    %86 = tpu.matmul %84, %85, %cst_25 {dimension_numbers = #tpu.dot_dimension_numbers<[2], [2], [1], [1], [0, 0, 0, 1, 1, 1], [0], [0]>} : vector<4x8x32xbf16>, vector<4x8x32xbf16>, vector<4x8x8xf32> -> vector<4x8x8xf32>
    "tpu.trace_stop"() : () -> ()
    %cst_26 = arith.constant dense<0xFF800000> : vector<4x8xf32>
    %87 = vector.multi_reduction <maximumf>, %86, %cst_26 [2] : vector<4x8x8xf32> to vector<4x8xf32>
    %88 = vector.shape_cast %87 : vector<4x8xf32> to vector<4x8x1xf32>
    %89 = vector.broadcast %88 : vector<4x8x1xf32> to vector<4x8x8xf32>
    %90 = arith.subf %86, %89 : vector<4x8x8xf32>
    %91 = math.exp %90 : vector<4x8x8xf32>
    %cst_27 = arith.constant dense<0.000000e+00> : vector<4x8xf32>
    %92 = vector.multi_reduction <add>, %91, %cst_27 [2] : vector<4x8x8xf32> to vector<4x8xf32>
    %93 = vector.shape_cast %92 : vector<4x8xf32> to vector<4x8x1xf32>
    %94 = tpu.reciprocal %93 {approx = true} : vector<4x8x1xf32> -> vector<4x8x1xf32>
    %95 = vector.broadcast %94 : vector<4x8x1xf32> to vector<4x8x8xf32>
    %96 = arith.mulf %91, %95 : vector<4x8x8xf32>
    %97 = arith.truncf %96 : vector<4x8x8xf32> to vector<4x8x8xbf16>
    %98 = arith.truncf %79 : vector<4x8x32xf32> to vector<4x8x32xbf16>
    "tpu.trace_start"() <{level = 10 : i32, message = "zqk,zke->zqe"}> : () -> ()
    %cst_28 = arith.constant dense<0.000000e+00> : vector<4x8x32xf32>
    %99 = tpu.matmul %97, %98, %cst_28 {dimension_numbers = #tpu.dot_dimension_numbers<[2], [1], [1], [2], [0, 0, 0, 1, 1, 2], [0], [0]>} : vector<4x8x8xbf16>, vector<4x8x32xbf16>, vector<4x8x32xf32> -> vector<4x8x32xf32>
    "tpu.trace_stop"() : () -> ()
    %100 = vector.shape_cast %99 : vector<4x8x32xf32> to vector<2x2x8x32xf32>
    %cst_29 = arith.constant dense<0.000000e+00> : vector<2x8x32xf32>
    %101 = vector.multi_reduction <add>, %100, %cst_29 [0] : vector<2x2x8x32xf32> to vector<2x8x32xf32>
    %102 = vector.shape_cast %101 : vector<2x8x32xf32> to vector<16x32xf32>
    %103 = arith.truncf %102 : vector<16x32xf32> to vector<16x32xbf16>
    %c0_30 = arith.constant 0 : index
    %c0_31 = arith.constant 0 : index
    %c0_32 = arith.constant 0 : index
    %104 = vector.load %arg8[%c0_30, %c0_31, %c0_32] : memref<2x32x32xbf16, #tpu.memory_space<vmem>>, vector<1x32x32xbf16>
    %105 = vector.shape_cast %104 : vector<1x32x32xbf16> to vector<32x32xbf16>
    %cst_33 = arith.constant dense<0.000000e+00> : vector<16x32xf32>
    %106 = tpu.matmul %103, %105, %cst_33 {dimension_numbers = #tpu.dot_dimension_numbers<[1], [0], [0], [1], [0, 0, 1, 1], [], []>} : vector<16x32xbf16>, vector<32x32xbf16>, vector<16x32xf32> -> vector<16x32xf32>
    %c0_34 = arith.constant 0 : index
    %c0_35 = arith.constant 0 : index
    %c0_36 = arith.constant 0 : index
    %107 = vector.load %arg9[%c0_34, %c0_35, %c0_36] : memref<2x1x32xf32, #tpu.memory_space<vmem>>, vector<1x1x32xf32>
    %108 = vector.shape_cast %107 : vector<1x1x32xf32> to vector<1x32xf32>
    %109 = vector.broadcast %108 : vector<1x32xf32> to vector<16x32xf32>
    %110 = arith.addf %106, %109 : vector<16x32xf32>
    %111 = arith.addf %40, %110 : vector<16x32xf32>
    %c0_37 = arith.constant 0 : index
    %c0_38 = arith.constant 0 : index
    %c0_39 = arith.constant 0 : index
    %112 = vector.load %arg10[%c0_37, %c0_38, %c0_39] : memref<2x1x32xf32, #tpu.memory_space<vmem>>, vector<1x1x32xf32>
    %113 = vector.shape_cast %112 : vector<1x1x32xf32> to vector<1x32xf32>
    %c0_40 = arith.constant 0 : index
    %c0_41 = arith.constant 0 : index
    %c0_42 = arith.constant 0 : index
    %114 = vector.load %arg11[%c0_40, %c0_41, %c0_42] : memref<2x1x32xf32, #tpu.memory_space<vmem>>, vector<1x1x32xf32>
    %115 = vector.shape_cast %114 : vector<1x1x32xf32> to vector<1x32xf32>
    %cst_43 = arith.constant dense<0.000000e+00> : vector<16xf32>
    %116 = vector.multi_reduction <add>, %111, %cst_43 [1] : vector<16x32xf32> to vector<16xf32>
    %117 = vector.shape_cast %116 : vector<16xf32> to vector<16x1xf32>
    %cst_44 = arith.constant 3.200000e+01 : f32
    %118 = vector.broadcast %cst_44 : f32 to vector<16x1xf32>
    %119 = arith.divf %117, %118 : vector<16x1xf32>
    %120 = vector.broadcast %119 : vector<16x1xf32> to vector<16x32xf32>
    %121 = arith.subf %111, %120 : vector<16x32xf32>
    %122 = arith.mulf %121, %121 : vector<16x32xf32>
    %cst_45 = arith.constant dense<0.000000e+00> : vector<16xf32>
    %123 = vector.multi_reduction <add>, %122, %cst_45 [1] : vector<16x32xf32> to vector<16xf32>
    %124 = vector.shape_cast %123 : vector<16xf32> to vector<16x1xf32>
    %cst_46 = arith.constant 3.200000e+01 : f32
    %125 = vector.broadcast %cst_46 : f32 to vector<16x1xf32>
    %126 = arith.divf %124, %125 : vector<16x1xf32>
    %127 = vector.broadcast %119 : vector<16x1xf32> to vector<16x32xf32>
    %128 = arith.subf %111, %127 : vector<16x32xf32>
    %cst_47 = arith.constant 9.99999996E-13 : f32
    %129 = vector.broadcast %cst_47 : f32 to vector<16x1xf32>
    %130 = arith.addf %126, %129 : vector<16x1xf32>
    %131 = math.rsqrt %130 : vector<16x1xf32>
    %132 = vector.broadcast %131 : vector<16x1xf32> to vector<16x32xf32>
    %133 = arith.mulf %128, %132 : vector<16x32xf32>
    %134 = vector.broadcast %113 : vector<1x32xf32> to vector<16x32xf32>
    %135 = arith.mulf %133, %134 : vector<16x32xf32>
    %136 = vector.broadcast %115 : vector<1x32xf32> to vector<16x32xf32>
    %137 = arith.addf %135, %136 : vector<16x32xf32>
    %138 = arith.truncf %137 : vector<16x32xf32> to vector<16x32xbf16>
    %c0_48 = arith.constant 0 : index
    %c0_49 = arith.constant 0 : index
    %c0_50 = arith.constant 0 : index
    %139 = vector.load %arg12[%c0_48, %c0_49, %c0_50] : memref<2x32x64xbf16, #tpu.memory_space<vmem>>, vector<1x32x64xbf16>
    %140 = vector.shape_cast %139 : vector<1x32x64xbf16> to vector<32x64xbf16>
    %cst_51 = arith.constant dense<0.000000e+00> : vector<16x64xf32>
    %141 = tpu.matmul %138, %140, %cst_51 {dimension_numbers = #tpu.dot_dimension_numbers<[1], [0], [0], [1], [0, 0, 1, 1], [], []>} : vector<16x32xbf16>, vector<32x64xbf16>, vector<16x64xf32> -> vector<16x64xf32>
    %c0_52 = arith.constant 0 : index
    %c0_53 = arith.constant 0 : index
    %c0_54 = arith.constant 0 : index
    %142 = vector.load %arg13[%c0_52, %c0_53, %c0_54] : memref<2x1x64xf32, #tpu.memory_space<vmem>>, vector<1x1x64xf32>
    %143 = vector.shape_cast %142 : vector<1x1x64xf32> to vector<1x64xf32>
    %144 = vector.broadcast %143 : vector<1x64xf32> to vector<16x64xf32>
    %145 = arith.addf %141, %144 : vector<16x64xf32>
    %cst_55 = arith.constant 5.000000e-01 : f32
    %146 = vector.broadcast %cst_55 : f32 to vector<16x64xf32>
    %147 = arith.mulf %146, %145 : vector<16x64xf32>
    %cst_56 = arith.constant 4.471500e-02 : f32
    %148 = vector.broadcast %cst_56 : f32 to vector<16x64xf32>
    %149 = arith.mulf %148, %145 : vector<16x64xf32>
    %150 = arith.mulf %149, %145 : vector<16x64xf32>
    %151 = arith.mulf %150, %145 : vector<16x64xf32>
    %152 = arith.addf %145, %151 : vector<16x64xf32>
    %cst_57 = arith.constant 0.797884583 : f32
    %153 = vector.broadcast %cst_57 : f32 to vector<16x64xf32>
    %154 = arith.mulf %153, %152 : vector<16x64xf32>
    %155 = math.tanh %154 : vector<16x64xf32>
    %cst_58 = arith.constant 1.000000e+00 : f32
    %156 = vector.broadcast %cst_58 : f32 to vector<16x64xf32>
    %157 = arith.addf %156, %155 : vector<16x64xf32>
    %158 = arith.mulf %147, %157 : vector<16x64xf32>
    %159 = arith.truncf %158 : vector<16x64xf32> to vector<16x64xbf16>
    %c0_59 = arith.constant 0 : index
    %c0_60 = arith.constant 0 : index
    %c0_61 = arith.constant 0 : index
    %160 = vector.load %arg14[%c0_59, %c0_60, %c0_61] : memref<2x64x32xbf16, #tpu.memory_space<vmem>>, vector<1x64x32xbf16>
    %161 = vector.shape_cast %160 : vector<1x64x32xbf16> to vector<64x32xbf16>
    %cst_62 = arith.constant dense<0.000000e+00> : vector<16x32xf32>
    %162 = tpu.matmul %159, %161, %cst_62 {dimension_numbers = #tpu.dot_dimension_numbers<[1], [0], [0], [1], [0, 0, 1, 1], [], []>} : vector<16x64xbf16>, vector<64x32xbf16>, vector<16x32xf32> -> vector<16x32xf32>
    %c0_63 = arith.constant 0 : index
    %c0_64 = arith.constant 0 : index
    %c0_65 = arith.constant 0 : index
    %163 = vector.load %arg15[%c0_63, %c0_64, %c0_65] : memref<2x1x32xf32, #tpu.memory_space<vmem>>, vector<1x1x32xf32>
    %164 = vector.shape_cast %163 : vector<1x1x32xf32> to vector<1x32xf32>
    %165 = vector.broadcast %164 : vector<1x32xf32> to vector<16x32xf32>
    %166 = arith.addf %162, %165 : vector<16x32xf32>
    %167 = arith.addf %137, %166 : vector<16x32xf32>
    %c0_66 = arith.constant 0 : index
    %c0_67 = arith.constant 0 : index
    %c0_68 = arith.constant 0 : index
    %168 = vector.load %arg16[%c0_66, %c0_67, %c0_68] : memref<2x1x32xf32, #tpu.memory_space<vmem>>, vector<1x1x32xf32>
    %169 = vector.shape_cast %168 : vector<1x1x32xf32> to vector<1x32xf32>
    %c0_69 = arith.constant 0 : index
    %c0_70 = arith.constant 0 : index
    %c0_71 = arith.constant 0 : index
    %170 = vector.load %arg17[%c0_69, %c0_70, %c0_71] : memref<2x1x32xf32, #tpu.memory_space<vmem>>, vector<1x1x32xf32>
    %171 = vector.shape_cast %170 : vector<1x1x32xf32> to vector<1x32xf32>
    %cst_72 = arith.constant dense<0.000000e+00> : vector<16xf32>
    %172 = vector.multi_reduction <add>, %167, %cst_72 [1] : vector<16x32xf32> to vector<16xf32>
    %173 = vector.shape_cast %172 : vector<16xf32> to vector<16x1xf32>
    %cst_73 = arith.constant 3.200000e+01 : f32
    %174 = vector.broadcast %cst_73 : f32 to vector<16x1xf32>
    %175 = arith.divf %173, %174 : vector<16x1xf32>
    %176 = vector.broadcast %175 : vector<16x1xf32> to vector<16x32xf32>
    %177 = arith.subf %167, %176 : vector<16x32xf32>
    %178 = arith.mulf %177, %177 : vector<16x32xf32>
    %cst_74 = arith.constant dense<0.000000e+00> : vector<16xf32>
    %179 = vector.multi_reduction <add>, %178, %cst_74 [1] : vector<16x32xf32> to vector<16xf32>
    %180 = vector.shape_cast %179 : vector<16xf32> to vector<16x1xf32>
    %cst_75 = arith.constant 3.200000e+01 : f32
    %181 = vector.broadcast %cst_75 : f32 to vector<16x1xf32>
    %182 = arith.divf %180, %181 : vector<16x1xf32>
    %183 = vector.broadcast %175 : vector<16x1xf32> to vector<16x32xf32>
    %184 = arith.subf %167, %183 : vector<16x32xf32>
    %cst_76 = arith.constant 9.99999996E-13 : f32
    %185 = vector.broadcast %cst_76 : f32 to vector<16x1xf32>
    %186 = arith.addf %182, %185 : vector<16x1xf32>
    %187 = math.rsqrt %186 : vector<16x1xf32>
    %188 = vector.broadcast %187 : vector<16x1xf32> to vector<16x32xf32>
    %189 = arith.mulf %184, %188 : vector<16x32xf32>
    %190 = vector.broadcast %169 : vector<1x32xf32> to vector<16x32xf32>
    %191 = arith.mulf %189, %190 : vector<16x32xf32>
    %192 = vector.broadcast %171 : vector<1x32xf32> to vector<16x32xf32>
    %193 = arith.addf %191, %192 : vector<16x32xf32>
    %194 = arith.truncf %193 : vector<16x32xf32> to vector<16x32xbf16>
    %c1 = arith.constant 1 : index
    %c0_77 = arith.constant 0 : index
    %c0_78 = arith.constant 0 : index
    %195 = vector.load %arg6[%c1, %c0_77, %c0_78] : memref<2x32x96xbf16, #tpu.memory_space<vmem>>, vector<1x32x96xbf16>
    %196 = vector.shape_cast %195 : vector<1x32x96xbf16> to vector<32x96xbf16>
    %cst_79 = arith.constant dense<0.000000e+00> : vector<16x96xf32>
    %197 = tpu.matmul %194, %196, %cst_79 {dimension_numbers = #tpu.dot_dimension_numbers<[1], [0], [0], [1], [0, 0, 1, 1], [], []>} : vector<16x32xbf16>, vector<32x96xbf16>, vector<16x96xf32> -> vector<16x96xf32>
    %c1_80 = arith.constant 1 : index
    %c0_81 = arith.constant 0 : index
    %c0_82 = arith.constant 0 : index
    %198 = vector.load %arg7[%c1_80, %c0_81, %c0_82] : memref<2x1x96xf32, #tpu.memory_space<vmem>>, vector<1x1x96xf32>
    %199 = vector.shape_cast %198 : vector<1x1x96xf32> to vector<1x96xf32>
    %200 = vector.broadcast %199 : vector<1x96xf32> to vector<16x96xf32>
    %201 = arith.addf %197, %200 : vector<16x96xf32>
    %202 = vector.extract_strided_slice %201 {offsets = [0, 0], sizes = [16, 32], strides = [1, 1]} : vector<16x96xf32> to vector<16x32xf32>
    %203 = vector.shape_cast %202 : vector<16x32xf32> to vector<2x8x32xf32>
    %204 = vector.extract_strided_slice %201 {offsets = [0, 32], sizes = [16, 32], strides = [1, 1]} : vector<16x96xf32> to vector<16x32xf32>
    %205 = vector.shape_cast %204 : vector<16x32xf32> to vector<2x8x32xf32>
    %206 = vector.extract_strided_slice %201 {offsets = [0, 64], sizes = [16, 32], strides = [1, 1]} : vector<16x96xf32> to vector<16x32xf32>
    %207 = vector.shape_cast %206 : vector<16x32xf32> to vector<2x8x32xf32>
    %208 = vector.shape_cast %203 : vector<2x8x32xf32> to vector<1x2x8x32xf32>
    %209 = vector.broadcast %208 : vector<1x2x8x32xf32> to vector<2x2x8x32xf32>
    %210 = vector.broadcast %55 : vector<2x1x1x32xf32> to vector<2x2x8x32xf32>
    %211 = arith.mulf %209, %210 : vector<2x2x8x32xf32>
    %212 = vector.shape_cast %211 : vector<2x2x8x32xf32> to vector<4x8x32xf32>
    %213 = vector.shape_cast %207 : vector<2x8x32xf32> to vector<1x2x8x32xf32>
    %214 = vector.broadcast %213 : vector<1x2x8x32xf32> to vector<2x2x8x32xf32>
    %215 = vector.broadcast %53 : vector<2x1x1x32xf32> to vector<2x2x8x32xf32>
    %216 = arith.mulf %214, %215 : vector<2x2x8x32xf32>
    %217 = vector.shape_cast %216 : vector<2x2x8x32xf32> to vector<4x8x32xf32>
    %218 = vector.shape_cast %205 : vector<2x8x32xf32> to vector<1x2x8x32xf32>
    %219 = vector.shape_cast %218 : vector<1x2x8x32xf32> to vector<1x2x8x32xf32>
    %220 = vector.broadcast %219 : vector<1x2x8x32xf32> to vector<2x2x8x32xf32>
    %221 = vector.shape_cast %220 : vector<2x2x8x32xf32> to vector<4x8x32xf32>
    %222 = arith.truncf %212 : vector<4x8x32xf32> to vector<4x8x32xbf16>
    %223 = arith.truncf %221 : vector<4x8x32xf32> to vector<4x8x32xbf16>
    "tpu.trace_start"() <{level = 10 : i32, message = "zqe,zke->zqk"}> : () -> ()
    %cst_83 = arith.constant dense<0.000000e+00> : vector<4x8x8xf32>
    %224 = tpu.matmul %222, %223, %cst_83 {dimension_numbers = #tpu.dot_dimension_numbers<[2], [2], [1], [1], [0, 0, 0, 1, 1, 1], [0], [0]>} : vector<4x8x32xbf16>, vector<4x8x32xbf16>, vector<4x8x8xf32> -> vector<4x8x8xf32>
    "tpu.trace_stop"() : () -> ()
    %cst_84 = arith.constant dense<0xFF800000> : vector<4x8xf32>
    %225 = vector.multi_reduction <maximumf>, %224, %cst_84 [2] : vector<4x8x8xf32> to vector<4x8xf32>
    %226 = vector.shape_cast %225 : vector<4x8xf32> to vector<4x8x1xf32>
    %227 = vector.broadcast %226 : vector<4x8x1xf32> to vector<4x8x8xf32>
    %228 = arith.subf %224, %227 : vector<4x8x8xf32>
    %229 = math.exp %228 : vector<4x8x8xf32>
    %cst_85 = arith.constant dense<0.000000e+00> : vector<4x8xf32>
    %230 = vector.multi_reduction <add>, %229, %cst_85 [2] : vector<4x8x8xf32> to vector<4x8xf32>
    %231 = vector.shape_cast %230 : vector<4x8xf32> to vector<4x8x1xf32>
    %232 = tpu.reciprocal %231 {approx = true} : vector<4x8x1xf32> -> vector<4x8x1xf32>
    %233 = vector.broadcast %232 : vector<4x8x1xf32> to vector<4x8x8xf32>
    %234 = arith.mulf %229, %233 : vector<4x8x8xf32>
    %235 = arith.truncf %234 : vector<4x8x8xf32> to vector<4x8x8xbf16>
    %236 = arith.truncf %217 : vector<4x8x32xf32> to vector<4x8x32xbf16>
    "tpu.trace_start"() <{level = 10 : i32, message = "zqk,zke->zqe"}> : () -> ()
    %cst_86 = arith.constant dense<0.000000e+00> : vector<4x8x32xf32>
    %237 = tpu.matmul %235, %236, %cst_86 {dimension_numbers = #tpu.dot_dimension_numbers<[2], [1], [1], [2], [0, 0, 0, 1, 1, 2], [0], [0]>} : vector<4x8x8xbf16>, vector<4x8x32xbf16>, vector<4x8x32xf32> -> vector<4x8x32xf32>
    "tpu.trace_stop"() : () -> ()
    %238 = vector.shape_cast %237 : vector<4x8x32xf32> to vector<2x2x8x32xf32>
    %cst_87 = arith.constant dense<0.000000e+00> : vector<2x8x32xf32>
    %239 = vector.multi_reduction <add>, %238, %cst_87 [0] : vector<2x2x8x32xf32> to vector<2x8x32xf32>
    %240 = vector.shape_cast %239 : vector<2x8x32xf32> to vector<16x32xf32>
    %241 = arith.truncf %240 : vector<16x32xf32> to vector<16x32xbf16>
    %c1_88 = arith.constant 1 : index
    %c0_89 = arith.constant 0 : index
    %c0_90 = arith.constant 0 : index
    %242 = vector.load %arg8[%c1_88, %c0_89, %c0_90] : memref<2x32x32xbf16, #tpu.memory_space<vmem>>, vector<1x32x32xbf16>
    %243 = vector.shape_cast %242 : vector<1x32x32xbf16> to vector<32x32xbf16>
    %cst_91 = arith.constant dense<0.000000e+00> : vector<16x32xf32>
    %244 = tpu.matmul %241, %243, %cst_91 {dimension_numbers = #tpu.dot_dimension_numbers<[1], [0], [0], [1], [0, 0, 1, 1], [], []>} : vector<16x32xbf16>, vector<32x32xbf16>, vector<16x32xf32> -> vector<16x32xf32>
    %c1_92 = arith.constant 1 : index
    %c0_93 = arith.constant 0 : index
    %c0_94 = arith.constant 0 : index
    %245 = vector.load %arg9[%c1_92, %c0_93, %c0_94] : memref<2x1x32xf32, #tpu.memory_space<vmem>>, vector<1x1x32xf32>
    %246 = vector.shape_cast %245 : vector<1x1x32xf32> to vector<1x32xf32>
    %247 = vector.broadcast %246 : vector<1x32xf32> to vector<16x32xf32>
    %248 = arith.addf %244, %247 : vector<16x32xf32>
    %249 = arith.addf %193, %248 : vector<16x32xf32>
    %c1_95 = arith.constant 1 : index
    %c0_96 = arith.constant 0 : index
    %c0_97 = arith.constant 0 : index
    %250 = vector.load %arg10[%c1_95, %c0_96, %c0_97] : memref<2x1x32xf32, #tpu.memory_space<vmem>>, vector<1x1x32xf32>
    %251 = vector.shape_cast %250 : vector<1x1x32xf32> to vector<1x32xf32>
    %c1_98 = arith.constant 1 : index
    %c0_99 = arith.constant 0 : index
    %c0_100 = arith.constant 0 : index
    %252 = vector.load %arg11[%c1_98, %c0_99, %c0_100] : memref<2x1x32xf32, #tpu.memory_space<vmem>>, vector<1x1x32xf32>
    %253 = vector.shape_cast %252 : vector<1x1x32xf32> to vector<1x32xf32>
    %cst_101 = arith.constant dense<0.000000e+00> : vector<16xf32>
    %254 = vector.multi_reduction <add>, %249, %cst_101 [1] : vector<16x32xf32> to vector<16xf32>
    %255 = vector.shape_cast %254 : vector<16xf32> to vector<16x1xf32>
    %cst_102 = arith.constant 3.200000e+01 : f32
    %256 = vector.broadcast %cst_102 : f32 to vector<16x1xf32>
    %257 = arith.divf %255, %256 : vector<16x1xf32>
    %258 = vector.broadcast %257 : vector<16x1xf32> to vector<16x32xf32>
    %259 = arith.subf %249, %258 : vector<16x32xf32>
    %260 = arith.mulf %259, %259 : vector<16x32xf32>
    %cst_103 = arith.constant dense<0.000000e+00> : vector<16xf32>
    %261 = vector.multi_reduction <add>, %260, %cst_103 [1] : vector<16x32xf32> to vector<16xf32>
    %262 = vector.shape_cast %261 : vector<16xf32> to vector<16x1xf32>
    %cst_104 = arith.constant 3.200000e+01 : f32
    %263 = vector.broadcast %cst_104 : f32 to vector<16x1xf32>
    %264 = arith.divf %262, %263 : vector<16x1xf32>
    %265 = vector.broadcast %257 : vector<16x1xf32> to vector<16x32xf32>
    %266 = arith.subf %249, %265 : vector<16x32xf32>
    %cst_105 = arith.constant 9.99999996E-13 : f32
    %267 = vector.broadcast %cst_105 : f32 to vector<16x1xf32>
    %268 = arith.addf %264, %267 : vector<16x1xf32>
    %269 = math.rsqrt %268 : vector<16x1xf32>
    %270 = vector.broadcast %269 : vector<16x1xf32> to vector<16x32xf32>
    %271 = arith.mulf %266, %270 : vector<16x32xf32>
    %272 = vector.broadcast %251 : vector<1x32xf32> to vector<16x32xf32>
    %273 = arith.mulf %271, %272 : vector<16x32xf32>
    %274 = vector.broadcast %253 : vector<1x32xf32> to vector<16x32xf32>
    %275 = arith.addf %273, %274 : vector<16x32xf32>
    %276 = arith.truncf %275 : vector<16x32xf32> to vector<16x32xbf16>
    %c1_106 = arith.constant 1 : index
    %c0_107 = arith.constant 0 : index
    %c0_108 = arith.constant 0 : index
    %277 = vector.load %arg12[%c1_106, %c0_107, %c0_108] : memref<2x32x64xbf16, #tpu.memory_space<vmem>>, vector<1x32x64xbf16>
    %278 = vector.shape_cast %277 : vector<1x32x64xbf16> to vector<32x64xbf16>
    %cst_109 = arith.constant dense<0.000000e+00> : vector<16x64xf32>
    %279 = tpu.matmul %276, %278, %cst_109 {dimension_numbers = #tpu.dot_dimension_numbers<[1], [0], [0], [1], [0, 0, 1, 1], [], []>} : vector<16x32xbf16>, vector<32x64xbf16>, vector<16x64xf32> -> vector<16x64xf32>
    %c1_110 = arith.constant 1 : index
    %c0_111 = arith.constant 0 : index
    %c0_112 = arith.constant 0 : index
    %280 = vector.load %arg13[%c1_110, %c0_111, %c0_112] : memref<2x1x64xf32, #tpu.memory_space<vmem>>, vector<1x1x64xf32>
    %281 = vector.shape_cast %280 : vector<1x1x64xf32> to vector<1x64xf32>
    %282 = vector.broadcast %281 : vector<1x64xf32> to vector<16x64xf32>
    %283 = arith.addf %279, %282 : vector<16x64xf32>
    %cst_113 = arith.constant 5.000000e-01 : f32
    %284 = vector.broadcast %cst_113 : f32 to vector<16x64xf32>
    %285 = arith.mulf %284, %283 : vector<16x64xf32>
    %cst_114 = arith.constant 4.471500e-02 : f32
    %286 = vector.broadcast %cst_114 : f32 to vector<16x64xf32>
    %287 = arith.mulf %286, %283 : vector<16x64xf32>
    %288 = arith.mulf %287, %283 : vector<16x64xf32>
    %289 = arith.mulf %288, %283 : vector<16x64xf32>
    %290 = arith.addf %283, %289 : vector<16x64xf32>
    %cst_115 = arith.constant 0.797884583 : f32
    %291 = vector.broadcast %cst_115 : f32 to vector<16x64xf32>
    %292 = arith.mulf %291, %290 : vector<16x64xf32>
    %293 = math.tanh %292 : vector<16x64xf32>
    %cst_116 = arith.constant 1.000000e+00 : f32
    %294 = vector.broadcast %cst_116 : f32 to vector<16x64xf32>
    %295 = arith.addf %294, %293 : vector<16x64xf32>
    %296 = arith.mulf %285, %295 : vector<16x64xf32>
    %297 = arith.truncf %296 : vector<16x64xf32> to vector<16x64xbf16>
    %c1_117 = arith.constant 1 : index
    %c0_118 = arith.constant 0 : index
    %c0_119 = arith.constant 0 : index
    %298 = vector.load %arg14[%c1_117, %c0_118, %c0_119] : memref<2x64x32xbf16, #tpu.memory_space<vmem>>, vector<1x64x32xbf16>
    %299 = vector.shape_cast %298 : vector<1x64x32xbf16> to vector<64x32xbf16>
    %cst_120 = arith.constant dense<0.000000e+00> : vector<16x32xf32>
    %300 = tpu.matmul %297, %299, %cst_120 {dimension_numbers = #tpu.dot_dimension_numbers<[1], [0], [0], [1], [0, 0, 1, 1], [], []>} : vector<16x64xbf16>, vector<64x32xbf16>, vector<16x32xf32> -> vector<16x32xf32>
    %c1_121 = arith.constant 1 : index
    %c0_122 = arith.constant 0 : index
    %c0_123 = arith.constant 0 : index
    %301 = vector.load %arg15[%c1_121, %c0_122, %c0_123] : memref<2x1x32xf32, #tpu.memory_space<vmem>>, vector<1x1x32xf32>
    %302 = vector.shape_cast %301 : vector<1x1x32xf32> to vector<1x32xf32>
    %303 = vector.broadcast %302 : vector<1x32xf32> to vector<16x32xf32>
    %304 = arith.addf %300, %303 : vector<16x32xf32>
    %305 = arith.addf %275, %304 : vector<16x32xf32>
    %c1_124 = arith.constant 1 : index
    %c0_125 = arith.constant 0 : index
    %c0_126 = arith.constant 0 : index
    %306 = vector.load %arg16[%c1_124, %c0_125, %c0_126] : memref<2x1x32xf32, #tpu.memory_space<vmem>>, vector<1x1x32xf32>
    %307 = vector.shape_cast %306 : vector<1x1x32xf32> to vector<1x32xf32>
    %c1_127 = arith.constant 1 : index
    %c0_128 = arith.constant 0 : index
    %c0_129 = arith.constant 0 : index
    %308 = vector.load %arg17[%c1_127, %c0_128, %c0_129] : memref<2x1x32xf32, #tpu.memory_space<vmem>>, vector<1x1x32xf32>
    %309 = vector.shape_cast %308 : vector<1x1x32xf32> to vector<1x32xf32>
    %cst_130 = arith.constant dense<0.000000e+00> : vector<16xf32>
    %310 = vector.multi_reduction <add>, %305, %cst_130 [1] : vector<16x32xf32> to vector<16xf32>
    %311 = vector.shape_cast %310 : vector<16xf32> to vector<16x1xf32>
    %cst_131 = arith.constant 3.200000e+01 : f32
    %312 = vector.broadcast %cst_131 : f32 to vector<16x1xf32>
    %313 = arith.divf %311, %312 : vector<16x1xf32>
    %314 = vector.broadcast %313 : vector<16x1xf32> to vector<16x32xf32>
    %315 = arith.subf %305, %314 : vector<16x32xf32>
    %316 = arith.mulf %315, %315 : vector<16x32xf32>
    %cst_132 = arith.constant dense<0.000000e+00> : vector<16xf32>
    %317 = vector.multi_reduction <add>, %316, %cst_132 [1] : vector<16x32xf32> to vector<16xf32>
    %318 = vector.shape_cast %317 : vector<16xf32> to vector<16x1xf32>
    %cst_133 = arith.constant 3.200000e+01 : f32
    %319 = vector.broadcast %cst_133 : f32 to vector<16x1xf32>
    %320 = arith.divf %318, %319 : vector<16x1xf32>
    %321 = vector.broadcast %313 : vector<16x1xf32> to vector<16x32xf32>
    %322 = arith.subf %305, %321 : vector<16x32xf32>
    %cst_134 = arith.constant 9.99999996E-13 : f32
    %323 = vector.broadcast %cst_134 : f32 to vector<16x1xf32>
    %324 = arith.addf %320, %323 : vector<16x1xf32>
    %325 = math.rsqrt %324 : vector<16x1xf32>
    %326 = vector.broadcast %325 : vector<16x1xf32> to vector<16x32xf32>
    %327 = arith.mulf %322, %326 : vector<16x32xf32>
    %328 = vector.broadcast %307 : vector<1x32xf32> to vector<16x32xf32>
    %329 = arith.mulf %327, %328 : vector<16x32xf32>
    %330 = vector.broadcast %309 : vector<1x32xf32> to vector<16x32xf32>
    %331 = arith.addf %329, %330 : vector<16x32xf32>
    %332 = vector.shape_cast %331 : vector<16x32xf32> to vector<2x8x32xf32>
    %cst_135 = arith.constant dense<0.000000e+00> : vector<2x32xf32>
    %333 = vector.multi_reduction <add>, %332, %cst_135 [1] : vector<2x8x32xf32> to vector<2x32xf32>
    %334 = vector.extract_strided_slice %332 {offsets = [0, 0, 0], sizes = [2, 1, 32], strides = [1, 1, 1]} : vector<2x8x32xf32> to vector<2x1x32xf32>
    %335 = vector.shape_cast %334 : vector<2x1x32xf32> to vector<2x32xf32>
    %336 = arith.truncf %335 : vector<2x32xf32> to vector<2x32xbf16>
    %c0_136 = arith.constant 0 : index
    %c0_137 = arith.constant 0 : index
    %337 = vector.load %arg18[%c0_136, %c0_137] : memref<32x32xbf16, #tpu.memory_space<vmem>>, vector<32x32xbf16>
    %cst_138 = arith.constant dense<0.000000e+00> : vector<2x32xf32>
    %338 = tpu.matmul %336, %337, %cst_138 {dimension_numbers = #tpu.dot_dimension_numbers<[1], [0], [0], [1], [0, 0, 1, 1], [], []>} : vector<2x32xbf16>, vector<32x32xbf16>, vector<2x32xf32> -> vector<2x32xf32>
    %c0_139 = arith.constant 0 : index
    %c0_140 = arith.constant 0 : index
    %339 = vector.load %arg19[%c0_139, %c0_140] : memref<1x32xf32, #tpu.memory_space<vmem>>, vector<1x32xf32>
    %340 = vector.broadcast %339 : vector<1x32xf32> to vector<2x32xf32>
    %341 = arith.addf %338, %340 : vector<2x32xf32>
    %342 = math.tanh %341 : vector<2x32xf32>
    %343 = tpu.concatenate %333, %342 in 1 : vector<2x32xf32>, vector<2x32xf32> -> vector<2x64xf32>
    %c0_141 = arith.constant 0 : index
    %c0_142 = arith.constant 0 : index
    %344 = vector.load %arg20[%c0_141, %c0_142] : memref<2x64xf32, #tpu.memory_space<vmem>>, vector<2x64xf32>
    tpu.vector_store %arg20[%c0_141, %c0_142], %343 {strides = array<i32>} : memref<2x64xf32, #tpu.memory_space<vmem>>, vector<2x64xf32>,
    return
  }
}

</mosaic_0001>

<bundles_post_ra>
// kernel: mme2e_t_zh_forward_both.1
= control target key start
LH: loop header
LB: loop body
LE: loop exit
PB: predicated region body
PF: predicated region fallthrough
CT: control target
= control target key end

     0   :  { %v2575_v0 = vmov 0   ;;  %v2576_v9 = vmov 0.0   ;;  %vm104_vm0 = vcmask 1043456   ;;  %v68_v23 = vlaneseq  ;;  %s2578_s21 = smov 64   ;;  %s2580_s22 = smov 32   ;;  %s3134_s0 = inlined_call_operand.vmem [shape: s32[16,1], index: 0, kind: input, shape index: {}]   ;;  %s3135_s1 = inlined_call_operand.vmem [shape: f32[100,32], index: 1, kind: input, shape index: {}]   ;;  %s3136_s2 = inlined_call_operand.vmem [shape: f32[32,32], index: 2, kind: input, shape index: {}]   ;;  %s3137_s3 = inlined_call_operand.vmem [shape: f32[2,32], index: 3, kind: input, shape index: {}]   ;;  %s3138_s6 = inlined_call_operand.vmem [shape: bf16[2,32,96], index: 6, kind: input, shape index: {}]   ;;  %s3139_s4 = inlined_call_operand.vmem [shape: f32[1,32], index: 4, kind: input, shape index: {}]   ;;  %s3140_s5 = inlined_call_operand.vmem [shape: f32[1,32], index: 5, kind: input, shape index: {}]   ;;  %s3141_s7 = inlined_call_operand.vmem [shape: f32[2,1,96], index: 7, kind: input, shape index: {}]   ;;  %s3142_s8 = inlined_call_operand.vmem [shape: bf16[2,32,32], index: 8, kind: input, shape index: {}]   ;;  %s3143_s9 = inlined_call_operand.vmem [shape: f32[2,1,32], index: 9, kind: input, shape index: {}]   ;;  %s3144_s12 = inlined_call_operand.vmem [shape: bf16[2,32,64], index: 12, kind: input, shape index: {}]   ;;  %s3145_s10 = inlined_call_operand.vmem [shape: f32[2,1,32], index: 10, kind: input, shape index: {}]   ;;  %s3146_s11 = inlined_call_operand.vmem [shape: f32[2,1,32], index: 11, kind: input, shape index: {}]   ;;  %s3147_s14 = inlined_call_operand.vmem [shape: bf16[2,64,32], index: 14, kind: input, shape index: {}]   ;;  %s3148_s13 = inlined_call_operand.vmem [shape: f32[2,1,64], index: 13, kind: input, shape index: {}]   ;;  %s3149_s15 = inlined_call_operand.vmem [shape: f32[2,1,32], index: 15, kind: input, shape index: {}]   ;;  %s3150_s16 = inlined_call_operand.vmem [shape: f32[2,1,32], index: 16, kind: input, shape index: {}]   ;;  %s3151_s17 = inlined_call_operand.vmem [shape: f32[2,1,32], index: 17, kind: input, shape index: {}]   ;;  %s3152_s18 = inlined_call_operand.vmem [shape: bf16[32,32], index: 18, kind: input, shape index: {}]   ;;  %s3153_s19 = inlined_call_operand.vmem [shape: f32[1,32], index: 19, kind: input, shape index: {}]   ;;  %s3154_s20 = inlined_call_operand.vmem [shape: f32[2,64], index: 20, kind: output, shape index: {}]  }
   0x1   :  { %3158 = sst [smem:[#allocation2_spill]] %s3134_s0  ;;  %2490 = vset.pattern.permute.xlu0 %v2575_v0  ;;  %2284 = vmatprep.subr.bf16.mxu1 %v2576_v9  ;;  %vm97_vm1 = vcmask 818176   ;;  %vm191_vm4 = vcmask 261120   ;;  %vm2577_vm5 = vmmov 0   ;;  %v2081_v60 = vld [vmem:[%s3139_s4] ss:$0 sm:$0xff] }
   0x2   :  { %3159 = sst [smem:[#allocation3_spill]] %s3135_s1  ;;  %s3163_s23 = sld [smem:[#allocation2_spill]]  ;;  %v2735_v24 = vand.u32 127, %v68_v23  ;;  %2288 = vmatprep.mubr.msk.bf16.mxu1 %vm2577_vm5, %v2576_v9  ;;  %v2082_v0 = vld [vmem:[%s3140_s5] ss:$0 sm:$0xff]  ;;  %vm521_vm10 = vcmask 64512  }
   0x3   :  { %3160 = sst [smem:[#allocation4_spill]] %s3136_s2  ;;  %s3164_s25 = sld [smem:[#allocation3_spill]]  ;;  %vm1016_vm11 = vcmask 523264   ;;  %vm2001_vm12 = vcmask 1041409   ;;  %vm2069_vm13 = vcmask 517120  }
   0x4   :  { %3161 = sst [smem:[#allocation5_spill]] %s3137_s3  ;;  %vm237_vm6 = vcmp.lt.s32.totalorder %v2735_v24, 16  ;;  %s2579_s5 = smov 96   ;;  %vm236_vm7 = vcmp.ge.s32.totalorder %v2735_v24, 16  ;;  %vm238_vm8 = vcmp.lt.s32.totalorder %v2735_v24, 32 }
   0x5   :  { %3162 = sst [smem:[#allocation6_spill]] %s3138_s6  ;;  %s3166_s27 = sld [smem:[#allocation5_spill]]  ;;  %v2083_v51 = vsel %vm237_vm6, 1.0, %v2576_v9  ;;  %vm240_vm9 = vmand %vm236_vm7, %vm238_vm8 }
   0x6   :  { %s3167_s29 = sld [smem:[#allocation6_spill]] }
   0x8   :  { %v66_v1 = vld [vmem:[%s3163_s23] sm:$0xff]  ;;  %v67_v6 = vld [vmem:[%s3163_s23 + $0x8] sm:$0xff]  ;;  %s3165_s23 = sld [smem:[#allocation4_spill]] }
   0x9   :  { %v82_v2 = vld [vmem:[%s3164_s25] sm:$0xff]  ;;  %71 = vperm.xlu0 %2490, %v66_v1   ;;  %v83_v3 = vld [vmem:[%s3164_s25 + $0x8] sm:$0xff]  ;;  %v84_v4 = vld [vmem:[%s3164_s25 + $0x10] sm:$0xff] }
   0xa   :  { %v85_v5 = vld [vmem:[%s3164_s25 + $0x18] sm:$0xff]  ;;  %v2460_v7 = vpack.c.bf16 %v83_v3, %v82_v2  ;;  %v86_v10 = vld [vmem:[%s3164_s25 + $0x20] sm:$0xff]  ;;  %v87_v11 = vld [vmem:[%s3164_s25 + $0x28] sm:$0xff] }
   0xb   :  { %v2464_v8 = vpack.c.bf16 %v85_v5, %v84_v4  ;;  %v2468_v12 = vpack.c.bf16 %v87_v11, %v86_v10  ;;  %v88_v13 = vld [vmem:[%s3164_s25 + $0x30] sm:$0xff]  ;;  %v89_v14 = vld [vmem:[%s3164_s25 + $0x38] sm:$0xff]  ;;  %v90_v16 = vld [vmem:[%s3164_s25 + $0x40] sm:$0xff] }
   0xc   :  { %2461 = vmatprep.subr.bf16.mxu0 %v2460_v7  ;;  %v2472_v15 = vpack.c.bf16 %v89_v14, %v88_v13  ;;  %v91_v17 = vld [vmem:[%s3164_s25 + $0x48] sm:$0xff]  ;;  %v92_v19 = vld [vmem:[%s3164_s25 + $0x50] sm:$0xff]  ;;  %v93_v20 = vld [vmem:[%s3164_s25 + $0x58] sm:$0xff] }
   0xd   :  { %74 = vperm.xlu0 %2490, %v67_v6   ;;  %2463 = vmatpush3.bf16.msra.mxu0 %v2460_v7  ;;  %v2476_v18 = vpack.c.bf16 %v91_v17, %v90_v16  ;;  %v2480_v21 = vpack.c.bf16 %v93_v20, %v92_v19  ;;  %v94_v22 = vld [vmem:[%s3164_s25 + $0x60] sm:$0xf]  ;;  %v2492_v50 = vld [vmem:[%s3167_s29 + $0x8] sm:$0xff]  }
   0xe   :  { %2465 = vmatprep.subr.bf16.mxu0 %v2464_v8  ;;  %v95_v29 = vld [vmem:[%s3165_s23] sm:$0xff] }
   0xf   :  { %v2080_v32 = vld [vmem:[%s3166_s27] ss:$0 sm:$0xff] }
  0x10   :  { %v2491_v49 = vld [vmem:[%s3167_s29] sm:$0xff]  }
  0x11   :  { %2467 = vmatpush3.bf16.msra.mxu0 %v2464_v8  ;;  %2285 = vmatpush3.bf16.msra.mxu1 %v2491_v49  ;;  %v2085_v5 = vld [vmem:[%s3141_s7] ss:$0 sm:$0xff] }
  0x12   :  { %2469 = vmatprep.subr.bf16.mxu0 %v2468_v12  ;;  %2286 = vmatprep.subr.bf16.mxu1 %v2576_v9 }
  0x15   :  { %2471 = vmatpush3.bf16.msra.mxu0 %v2468_v12  ;;  %2287 = vmatpush3.bf16.msra.mxu1 %v2492_v50 }
  0x16   :  { %2473 = vmatprep.subr.bf16.mxu0 %v2472_v15  ;;  %2292 = vmatprep.subr.bf16.mxu1 %v2576_v9 }
  0x19   :  { %2475 = vmatpush3.bf16.msra.mxu0 %v2472_v15  ;;  %v2796_v15 = vmul.f32 0.25, %v2083_v51 }
  0x1a   :  { %2477 = vmatprep.subr.bf16.mxu0 %v2476_v18 }
  0x1d   :  { %2479 = vmatpush3.bf16.msra.mxu0 %v2476_v18  ;;  %v2084_v18 = vsel %vm240_vm9, 1.0, %v2576_v9 }
  0x1e   :  { %2481 = vmatprep.subr.bf16.mxu0 %v2480_v21 }
  0x21   :  { %2483 = vmatpush3.bf16.msra.mxu0 %v2480_v21 }
  0x22   :  { %2279 = vmatprep.subr.msk.mxu0 %vm104_vm0, %v94_v22 }
  0x25   :  { %2280 = vmatpush3.msk.msra.mxu0 %vm104_vm0, %v94_v22  ;;  %v2804_v22 = vmul.f32 0.25, %v2084_v18 }
  0x26   :  { %2310 = vmatprep.subr.bf16.mxu0 %v2576_v9 }
  0x88   :  { %v72_v25 = vpop.permute.xlu0 %71 }
  0x89   :  { %vm76_vm2 = vcmp.eq.s32.totalorder %v72_v25, %v2735_v24 }
  0x8a   :  { %v2075_v26 = vsel %vm76_vm2, 1.0, %v2576_v9 }
  0x8b   :  { %2281 = vmatprep.mubr.msk.f32.mxu0 %vm97_vm1, %v2075_v26 }
  0x8c   :  { %v75_v27 = vpop.permute.xlu0 %74 }
  0x8d   :  { %vm77_vm3 = vcmp.eq.s32.totalorder %v75_v27, %v2735_v24 }
  0x8e   :  { %v2076_v28 = vsel %vm77_vm3, 1.0, %v2576_v9 }
  0x8f   :  { %2282 = vmatmul.mubr.msk.f32.vlgmr.msra.gmra.mrb[0].mxu0 %vm97_vm1, %v2076_v28 }
  0x90   :  { %2312 = vmatprep.mubr.msk.bf16.mxu0 %vm2577_vm5, %v2576_v9 }
 0x162   :  { %v2283_v30 = vpop.f32.mrb[0].mxu0 }
 0x163   :  { %v174_v31 = vpop.f32.mrb[1].mxu0  ;;  %v180_v33 = vadd.f32 %v2283_v30, %v95_v29 }
 0x164   :  { %v175_v34 = vadd.f32 %v174_v31, %v95_v29 }
 0x165   :  { %v188_v37 = vadd.f32 %v2080_v32, %v180_v33 }
 0x166   :  { %v187_v35 = vadd.f32 %v2080_v32, %v175_v34 }
 0x167   :  { %v195_v38 = vsel %vm191_vm4, %v188_v37, 0.0 }
 0x168   :  { %v192_v36 = vsel %vm191_vm4, %v187_v35, 0.0 }
 0x169   :  { %193 = vadd.xlane.f32.xlu1 %v192_v36 }
 0x16d   :  { %196 = vadd.xlane.f32.xlu1 %v195_v38 }
 0x1f6   :  { %v194_v39 = vpop.xlane.xlu1 %193 }
 0x1f7   :  { %v199_v40 = vmul.f32 0.03125, %v194_v39 }
 0x1f9   :  { %v201_v41 = vsub.f32 %v187_v35, %v199_v40 }
 0x1fa   :  { %v197_v42 = vpop.xlane.xlu1 %196 }
 0x1fb   :  { %v200_v43 = vmul.f32 0.03125, %v197_v42  ;;  %v203_v44 = vmul.f32 %v201_v41, %v201_v41 }
 0x1fd   :  { %v202_v45 = vsub.f32 %v188_v37, %v200_v43  ;;  %v205_v46 = vsel %vm191_vm4, %v203_v44, 0.0 }
 0x1fe   :  { %206 = vadd.xlane.f32.xlu0 %v205_v46 }
 0x1ff   :  { %v204_v47 = vmul.f32 %v202_v45, %v202_v45 }
 0x201   :  { %v208_v48 = vsel %vm191_vm4, %v204_v47, 0.0 }
 0x202   :  { %209 = vadd.xlane.f32.xlu1 %v208_v48 }
 0x214   :  { %321 = vrot.lane.b32.xlu0 %v2083_v51, %s2578_s21 }
 0x28b   :  { %v207_v52 = vpop.xlane.xlu0 %206 }
 0x28c   :  { %v211_v53 = vmul.f32 0.03125, %v207_v52 }
 0x28e   :  { %v213_v54 = vadd.f32 1e-12, %v211_v53 }
 0x28f   :  { %v210_v55 = vpop.xlane.xlu1 %209  ;;  %v2832_v50 = vpop.permute.xlu0 %321 }
 0x290   :  { %2513 = vrsqrt.f32 %v213_v54  ;;  %v212_v56 = vmul.f32 0.03125, %v210_v55 }
 0x292   :  { %v214_v57 = vadd.f32 1e-12, %v212_v56 }
 0x294   :  { %2515 = vrsqrt.f32 %v214_v57 }
 0x29a   :  { %v2514_v58 = vpop.eup %2513 }
 0x29b   :  { %v217_v59 = vmul.f32 %v2514_v58, %v201_v41 }
 0x29d   :  { %v225_v63 = vmul.f32 %v2081_v60, %v217_v59 }
 0x29e   :  { %v2516_v61 = vpop.eup %2515 }
 0x29f   :  { %v218_v62 = vmul.f32 %v2516_v61, %v202_v45  ;;  %v2772_v2 = vadd.f32 %v2082_v0, %v225_v63 }
 0x2a1   :  { %v226_v1 = vmul.f32 %v2081_v60, %v218_v62 }
 0x2a3   :  { %v2774_v3 = vadd.f32 %v2082_v0, %v226_v1 }
 0x2a5   :  { %v247_v4 = vpack.c.bf16 %v2774_v3, %v2772_v2 }
 0x2a7   :  { %2289 = vmatmul.mubr.msk.bf16.vlgmr.msra.gmra.mrb[0].mxu1 %vm191_vm4, %v247_v4 }
 0x2a8   :  { %2294 = vmatprep.mubr.msk.bf16.mxu1 %vm2577_vm5, %v2576_v9 }
 0x37a   :  { %v308_v6 = vpop.f32.mrb[0].mxu1 }
 0x37b   :  { %v2784_v7 = vadd.f32 %v2085_v5, %v308_v6  ;;  %v2290_v8 = vpop.f32.mrb[1].mxu1 }
 0x37c   :  { %v311_v10 = vpop.f32.mrb[2].mxu1 }
 0x37d   :  { %v2786_v11 = vadd.f32 %v2085_v5, %v311_v10  ;;  %v2291_v12 = vpop.f32.mrb[3].mxu1  ;;  %v335_v13 = vpack.c.bf16 %v2784_v7, %v2784_v7  ;;  %v315_v19 = vmul.f32 %v2784_v7, %v2796_v15  ;;  %v317_v28 = vmul.f32 %v2784_v7, %v2804_v22 }
 0x37e   :  { %v327_v51 = vmul.f32 %v2832_v50, %v2784_v7 }
 0x37f   :  { %338 = vrot.lane.b32.xlu1 %v335_v13, %s2579_s5  ;;  %v336_v14 = vpack.c.bf16 %v2786_v11, %v2786_v11  ;;  %v331_v23 = vpack.c.bf16 %v315_v19, %v315_v19  ;;  %v318_v24 = vmul.f32 %v2786_v11, %v2804_v22  ;;  %v316_v26 = vmul.f32 %v2786_v11, %v2796_v15 }
 0x380   :  { %v333_v29 = vpack.c.bf16 %v317_v28, %v317_v28  ;;  %v570_v52 = vpack.c.bf16 %v327_v51, %v327_v51  ;;  %v328_v13 = vmul.f32 %v2832_v50, %v2786_v11 }
 0x381   :  { %v334_v25 = vpack.c.bf16 %v318_v24, %v318_v24  ;;  %v332_v27 = vpack.c.bf16 %v316_v26, %v316_v26 }
 0x383   :  { %387 = vrot.lane.b32.xlu1 %v336_v14, %s2579_s5 }
 0x3f1   :  { %v339_v16 = vpop.permute.xlu1 %338 }
 0x3f2   :  { %v344_v17 = vsel %vm191_vm4, %v339_v16, 0  ;;  %v571_v16 = vpack.c.bf16 %v328_v13, %v328_v13  ;;  %v2097_v13 = vld [vmem:[%s3143_s9] ss:$0 sm:$0xff] }
 0x3f3   :  { %2293 = vmatpush3.bf16.xpose.msra.mxu1 %v344_v17 }
 0x3f4   :  { %2298 = vmatprep.subr.bf16.mxu1 %v2576_v9 }
 0x3f5   :  { %v388_v20 = vpop.permute.xlu1 %387 }
 0x3f6   :  { %v393_v21 = vsel %vm191_vm4, %v388_v20, 0 }
 0x3f7   :  { %2311 = vmatpush3.bf16.xpose.msra.mxu0 %v393_v21 }
 0x3f8   :  { %2322 = vmatprep.subr.bf16.mxu0 %v2576_v9 }
 0x3fa   :  { %2295 = vmatmul.mubr.msk.bf16.vlgmr.msra.gmra.mrb[4].mxu1 %vm191_vm4, %v331_v23 }
 0x3fb   :  { %2299 = vmatpush3.bf16.xpose.msra.mxu1 %v393_v21  ;;  %2300 = vmatprep.mubr.msk.bf16.mxu1 %vm2577_vm5, %v2576_v9 }
 0x3fc   :  { %2304 = vmatprep.subr.bf16.mxu1 %v2576_v9 }
 0x3fe   :  { %2313 = vmatmul.mubr.msk.bf16.vlgmr.msra.gmra.mrb[4].mxu0 %vm191_vm4, %v334_v25 }
 0x3ff   :  { %2324 = vmatprep.mubr.msk.bf16.mxu0 %vm2577_vm5, %v2576_v9 }
 0x402   :  { %2301 = vmatmul.mubr.msk.bf16.vlgmr.msra.gmra.mrb[8].mxu1 %vm191_vm4, %v332_v27 }
 0x403   :  { %2305 = vmatpush3.bf16.xpose.msra.mxu1 %v344_v17  ;;  %2306 = vmatprep.mubr.msk.bf16.mxu1 %vm2577_vm5, %v2576_v9 }
 0x404   :  { %2316 = vmatprep.subr.bf16.mxu1 %v2576_v9 }
 0x40a   :  { %2307 = vmatmul.mubr.msk.bf16.vlgmr.msra.gmra.mrb[12].mxu1 %vm191_vm4, %v333_v29 }
 0x40b   :  { %2318 = vmatprep.mubr.msk.bf16.mxu1 %vm2577_vm5, %v2576_v9 }
 0x4cd   :  { %v380_v30 = vpop.f32.mrb[4].mxu1 }
 0x4ce   :  { %v2296_v31 = vpop.f32.mrb[5].mxu1  ;;  %v522_v32 = vsel %vm521_vm10, %v380_v30, -inf }
 0x4cf   :  { %523 = vmax.xlane.f32.xlu1 %v522_v32  ;;  %v383_v33 = vpop.f32.mrb[6].mxu1 }
 0x4d0   :  { %v2297_v34 = vpop.f32.mrb[7].mxu1 }
 0x4d1   :  { %v515_v35 = vpop.f32.mrb[4].mxu0 }
 0x4d2   :  { %v2314_v36 = vpop.f32.mrb[5].mxu0  ;;  %v531_v37 = vsel %vm521_vm10, %v515_v35, -inf }
 0x4d3   :  { %532 = vmax.xlane.f32.xlu0 %v531_v37  ;;  %v518_v38 = vpop.f32.mrb[6].mxu0 }
 0x4d4   :  { %v2315_v39 = vpop.f32.mrb[7].mxu0 }
 0x4d5   :  { %v429_v40 = vpop.f32.mrb[8].mxu1 }
 0x4d6   :  { %v2302_v41 = vpop.f32.mrb[9].mxu1  ;;  %v525_v42 = vsel %vm521_vm10, %v429_v40, -inf }
 0x4d7   :  { %526 = vmax.xlane.f32.xlu0 %v525_v42  ;;  %v432_v43 = vpop.f32.mrb[10].mxu1 }
 0x4d8   :  { %v2303_v44 = vpop.f32.mrb[11].mxu1 }
 0x4dd   :  { %v472_v45 = vpop.f32.mrb[12].mxu1 }
 0x4de   :  { %v2308_v46 = vpop.f32.mrb[13].mxu1  ;;  %v528_v47 = vsel %vm521_vm10, %v472_v45, -inf }
 0x4df   :  { %529 = vmax.xlane.f32.xlu0 %v528_v47  ;;  %v475_v48 = vpop.f32.mrb[14].mxu1  ;;  %v2494_v46 = vld [vmem:[%s3142_s8 + $0x8] sm:$0xff]  }
 0x4e0   :  { %v2309_v49 = vpop.f32.mrb[15].mxu1  ;;  %323 = vrot.lane.b32.xlu1 %v2084_v18, %s2578_s21 }
 0x4f5   :  { %575 = vrot.lane.b32.xlu0 %v570_v52, %s2578_s21 }
 0x55c   :  { %v524_v53 = vpop.xlane.xlu1 %523 }
 0x55d   :  { %v534_v54 = vsub.f32 %v380_v30, %v524_v53 }
 0x55f   :  { %v538_v55 = vmul.f32 1.442695, %v534_v54 }
 0x560   :  { %v533_v56 = vpop.xlane.xlu0 %532  ;;  %v2842_v12 = vpop.permute.xlu1 %323 }
 0x561   :  { %2517 = vpow2.f32 %v538_v55  ;;  %v537_v57 = vsub.f32 %v515_v35, %v533_v56  ;;  %v329_v14 = vmul.f32 %v2842_v12, %v2784_v7  ;;  %v330_v23 = vmul.f32 %v2842_v12, %v2786_v11 }
 0x563   :  { %v544_v58 = vmul.f32 1.442695, %v537_v57  ;;  %v572_v17 = vpack.c.bf16 %v329_v14, %v329_v14  ;;  %v573_v24 = vpack.c.bf16 %v330_v23, %v330_v23 }
 0x564   :  { %v527_v59 = vpop.xlane.xlu0 %526 }
 0x565   :  { %2519 = vpow2.f32 %v544_v58  ;;  %v535_v60 = vsub.f32 %v429_v40, %v527_v59 }
 0x567   :  { %v540_v61 = vmul.f32 1.442695, %v535_v60 }
 0x569   :  { %2521 = vpow2.f32 %v540_v61 }
 0x56b   :  { %v2518_v62 = vpop.eup %2517 }
 0x56c   :  { %v530_v63 = vpop.xlane.xlu0 %529  ;;  %v546_v0 = vsel %vm521_vm10, %v2518_v62, 0.0 }
 0x56d   :  { %547 = vadd.xlane.f32.xlu0 %v546_v0  ;;  %v536_v18 = vsub.f32 %v472_v45, %v530_v63  ;;  %v2493_v45 = vld [vmem:[%s3142_s8] sm:$0xff]  }
 0x56f   :  { %v2520_v1 = vpop.eup %2519  ;;  %v542_v19 = vmul.f32 1.442695, %v536_v18 }
 0x570   :  { %v576_v4 = vpop.permute.xlu0 %575  ;;  %v555_v5 = vsel %vm521_vm10, %v2520_v1, 0.0 }
 0x571   :  { %v581_v6 = vsel %vm104_vm0, %v576_v4, 0  ;;  %556 = vadd.xlane.f32.xlu0 %v555_v5  ;;  %2523 = vpow2.f32 %v542_v19 }
 0x572   :  { %2317 = vmatpush3.bf16.msra.mxu1 %v581_v6 }
 0x573   :  { %v2522_v8 = vpop.eup %2521  ;;  %2328 = vmatprep.subr.bf16.mxu1 %v2576_v9 }
 0x574   :  { %v549_v10 = vsel %vm521_vm10, %v2522_v8, 0.0 }
 0x575   :  { %550 = vadd.xlane.f32.xlu1 %v549_v10 }
 0x57b   :  { %v2524_v20 = vpop.eup %2523 }
 0x57c   :  { %v552_v21 = vsel %vm521_vm10, %v2524_v20, 0.0 }
 0x586   :  { %624 = vrot.lane.b32.xlu1 %v571_v16, %s2578_s21 }
 0x587   :  { %673 = vrot.lane.b32.xlu0 %v572_v17, %s2578_s21 }
 0x5a6   :  { %553 = vadd.xlane.f32.xlu0 %v552_v21 }
 0x5bc   :  { %722 = vrot.lane.b32.xlu0 %v573_v24, %s2578_s21 }
 0x5fa   :  { %v548_v7 = vpop.xlane.xlu0 %547 }
 0x5fb   :  { %2525 = vrcp.f32 %v548_v7 }
 0x5fe   :  { %v557_v25 = vpop.xlane.xlu0 %556 }
 0x602   :  { %v551_v26 = vpop.xlane.xlu1 %550  ;;  %v674_v30 = vpop.permute.xlu0 %673 }
 0x603   :  { %2527 = vrcp.f32 %v551_v26  ;;  %v679_v11 = vsel %vm104_vm0, %v674_v30, 0 }
 0x604   :  { %2529 = vrcp.f32 %v557_v25 }
 0x605   :  { %v2526_v27 = vpop.eup %2525 }
 0x606   :  { %v562_v28 = vmul.f32 %v2526_v27, %v2518_v62  ;;  %v625_v29 = vpop.permute.xlu1 %624 }
 0x607   :  { %v630_v31 = vsel %vm104_vm0, %v625_v29, 0 }
 0x608   :  { %2323 = vmatpush3.bf16.msra.mxu0 %v630_v31  ;;  %v566_v32 = vpack.c.bf16 %v562_v28, %v562_v28 }
 0x609   :  { %2334 = vmatprep.subr.bf16.mxu0 %v2576_v9 }
 0x60a   :  { %2319 = vmatmul.mubr.msk.bf16.vlgmr.msra.gmra.mrb[16].mxu1 %vm521_vm10, %v566_v32 }
 0x60b   :  { %2329 = vmatpush3.bf16.msra.mxu1 %v679_v11  ;;  %2330 = vmatprep.mubr.msk.bf16.mxu1 %vm2577_vm5, %v2576_v9 }
 0x60c   :  { %2340 = vmatprep.subr.bf16.mxu1 %v2576_v9 }
 0x60d   :  { %v2528_v33 = vpop.eup %2527 }
 0x60e   :  { %v563_v34 = vmul.f32 %v2528_v33, %v2522_v8  ;;  %v2530_v36 = vpop.eup %2529  ;;  %v2496_v33 = vld [vmem:[%s3144_s12 + $0x8] sm:$0xff]  }
 0x60f   :  { %v565_v38 = vmul.f32 %v2530_v36, %v2520_v1 }
 0x610   :  { %v567_v35 = vpack.c.bf16 %v563_v34, %v563_v34 }
 0x611   :  { %v569_v41 = vpack.c.bf16 %v565_v38, %v565_v38 }
 0x612   :  { %2325 = vmatmul.mubr.msk.bf16.vlgmr.msra.gmra.mrb[8].mxu0 %vm521_vm10, %v567_v35 }
 0x613   :  { %2336 = vmatprep.mubr.msk.bf16.mxu0 %vm2577_vm5, %v2576_v9 }
 0x633   :  { %v554_v37 = vpop.xlane.xlu0 %553 }
 0x634   :  { %2531 = vrcp.f32 %v554_v37 }
 0x637   :  { %v723_v39 = vpop.permute.xlu0 %722 }
 0x638   :  { %v728_v40 = vsel %vm104_vm0, %v723_v39, 0 }
 0x639   :  { %2335 = vmatpush3.bf16.msra.mxu0 %v728_v40 }
 0x63a   :  { %2348 = vmatprep.subr.bf16.mxu0 %v2576_v9 }
 0x63c   :  { %2337 = vmatmul.mubr.msk.bf16.vlgmr.msra.gmra.mrb[12].mxu0 %vm521_vm10, %v569_v41  ;;  %v2101_v41 = vld [vmem:[%s3145_s10] ss:$0 sm:$0xff] }
 0x63d   :  { %2352 = vmatprep.mubr.msk.bf16.mxu0 %vm2577_vm5, %v2576_v9 }
 0x63e   :  { %v2532_v42 = vpop.eup %2531 }
 0x63f   :  { %v564_v43 = vmul.f32 %v2532_v42, %v2524_v20 }
 0x641   :  { %v568_v44 = vpack.c.bf16 %v564_v43, %v564_v43 }
 0x643   :  { %2331 = vmatmul.mubr.msk.bf16.vlgmr.msra.gmra.mrb[20].mxu1 %vm521_vm10, %v568_v44 }
 0x644   :  { %2344 = vmatprep.mubr.msk.bf16.mxu1 %vm2577_vm5, %v2576_v9  ;;  %2341 = vmatpush3.bf16.msra.mxu1 %v2493_v45 }
 0x645   :  { %2342 = vmatprep.subr.bf16.mxu1 %v2576_v9 }
 0x648   :  { %2343 = vmatpush3.bf16.msra.mxu1 %v2494_v46  ;;  %v2102_v46 = vld [vmem:[%s3146_s11] ss:$0 sm:$0xff] }
 0x649   :  { %2356 = vmatprep.subr.bf16.mxu1 %v2576_v9 }
 0x6dd   :  { %v617_v47 = vpop.f32.mrb[16].mxu1 }
 0x6de   :  { %v2320_v48 = vpop.f32.mrb[17].mxu1  ;;  %v770_v0 = vsel %vm191_vm4, %v617_v47, 0.0 }
 0x6df   :  { %v620_v49 = vpop.f32.mrb[18].mxu1 }
 0x6e0   :  { %v2321_v51 = vpop.f32.mrb[19].mxu1 }
 0x6e5   :  { %v666_v52 = vpop.f32.mrb[8].mxu0 }
 0x6e6   :  { %v2326_v53 = vpop.f32.mrb[9].mxu0  ;;  %v773_v57 = vsel %vm191_vm4, %v666_v52, 0.0  ;;  %v2497_v52 = vld [vmem:[%s3147_s14] sm:$0xff]  }
 0x6e7   :  { %v669_v54 = vpop.f32.mrb[10].mxu0  ;;  %v2498_v53 = vld [vmem:[%s3147_s14 + $0x8] sm:$0xff]  }
 0x6e8   :  { %v2327_v55 = vpop.f32.mrb[11].mxu0  ;;  %v2499_v54 = vld [vmem:[%s3147_s14 + $0x10] sm:$0xff]  }
 0x6e9   :  { %v2500_v55 = vld [vmem:[%s3147_s14 + $0x18] sm:$0xff]  }
 0x70f   :  { %v764_v56 = vpop.f32.mrb[12].mxu0 }
 0x710   :  { %v774_v58 = vsel %vm191_vm4, %v764_v56, 0.0  ;;  %v2338_v59 = vpop.f32.mrb[13].mxu0  ;;  %v2103_v56 = vld [vmem:[%s3148_s13] ss:$0 sm:$0xff] }
 0x711   :  { %v775_v60 = vadd.f32 %v774_v58, %v773_v57  ;;  %v767_v61 = vpop.f32.mrb[14].mxu0 }
 0x712   :  { %v2339_v62 = vpop.f32.mrb[15].mxu0 }
 0x716   :  { %v715_v63 = vpop.f32.mrb[20].mxu1 }
 0x717   :  { %v771_v1 = vsel %vm191_vm4, %v715_v63, 0.0  ;;  %v2332_v4 = vpop.f32.mrb[21].mxu1 }
 0x718   :  { %v772_v5 = vadd.f32 %v771_v1, %v770_v0  ;;  %v718_v6 = vpop.f32.mrb[22].mxu1 }
 0x719   :  { %v2333_v8 = vpop.f32.mrb[23].mxu1 }
 0x71a   :  { %v776_v10 = vpack.c.bf16 %v775_v60, %v772_v5 }
 0x71c   :  { %2345 = vmatmul.mubr.msk.bf16.vlgmr.msra.gmra.mrb[24].mxu1 %vm191_vm4, %v776_v10 }
 0x71d   :  { %2364 = vmatprep.mubr.msk.bf16.mxu1 %vm2577_vm5, %v2576_v9  ;;  %2357 = vmatpush3.bf16.msra.mxu1 %v2497_v52 }
 0x71e   :  { %2358 = vmatprep.subr.bf16.mxu1 %v2576_v9 }
 0x721   :  { %2359 = vmatpush3.bf16.msra.mxu1 %v2498_v53  ;;  %v2113_v53 = vld [vmem:[%s3150_s16] ss:$0 sm:$0xff] }
 0x722   :  { %2360 = vmatprep.subr.bf16.mxu1 %v2576_v9 }
 0x725   :  { %2361 = vmatpush3.bf16.msra.mxu1 %v2499_v54 }
 0x726   :  { %2362 = vmatprep.subr.bf16.mxu1 %v2576_v9 }
 0x729   :  { %2363 = vmatpush3.bf16.msra.mxu1 %v2500_v55 }
 0x72a   :  { %2382 = vmatprep.subr.bf16.mxu1 %v2576_v9 }
 0x7ef   :  { %v837_v14 = vpop.f32.mrb[24].mxu1 }
 0x7f0   :  { %v838_v16 = vadd.f32 %v2097_v13, %v837_v14  ;;  %v2346_v17 = vpop.f32.mrb[25].mxu1 }
 0x7f1   :  { %v840_v18 = vpop.f32.mrb[26].mxu1 }
 0x7f2   :  { %v841_v19 = vadd.f32 %v2097_v13, %v840_v18  ;;  %v2347_v20 = vpop.f32.mrb[27].mxu1  ;;  %v844_v21 = vadd.f32 %v838_v16, %v2772_v2 }
 0x7f4   :  { %v848_v23 = vsel %vm191_vm4, %v844_v21, 0.0  ;;  %v845_v24 = vadd.f32 %v841_v19, %v2774_v3  ;;  %v2495_v3 = vld [vmem:[%s3144_s12] sm:$0xff]  }
 0x7f5   :  { %849 = vadd.xlane.f32.xlu1 %v848_v23  ;;  %2349 = vmatpush3.bf16.msra.mxu0 %v2495_v3 }
 0x7f6   :  { %v851_v7 = vsel %vm191_vm4, %v845_v24, 0.0  ;;  %2350 = vmatprep.subr.bf16.mxu0 %v2576_v9 }
 0x7f7   :  { %852 = vadd.xlane.f32.xlu0 %v851_v7 }
 0x7f9   :  { %2351 = vmatpush3.bf16.msra.mxu0 %v2496_v33 }
 0x7fa   :  { %2368 = vmatprep.subr.bf16.mxu0 %v2576_v9 }
 0x882   :  { %v850_v25 = vpop.xlane.xlu1 %849 }
 0x883   :  { %v854_v26 = vmul.f32 0.03125, %v850_v25  ;;  %v2107_v25 = vld [vmem:[%s3149_s15] ss:$0 sm:$0xff] }
 0x884   :  { %v853_v27 = vpop.xlane.xlu0 %852 }
 0x885   :  { %v856_v28 = vsub.f32 %v844_v21, %v854_v26  ;;  %v855_v29 = vmul.f32 0.03125, %v853_v27 }
 0x887   :  { %v857_v30 = vsub.f32 %v845_v24, %v855_v29  ;;  %v858_v31 = vmul.f32 %v856_v28, %v856_v28 }
 0x889   :  { %v860_v32 = vsel %vm191_vm4, %v858_v31, 0.0  ;;  %v859_v11 = vmul.f32 %v857_v30, %v857_v30 }
 0x88a   :  { %861 = vadd.xlane.f32.xlu0 %v860_v32 }
 0x88b   :  { %v863_v2 = vsel %vm191_vm4, %v859_v11, 0.0 }
 0x88c   :  { %864 = vadd.xlane.f32.xlu1 %v863_v2 }
 0x917   :  { %v862_v34 = vpop.xlane.xlu0 %861 }
 0x918   :  { %v866_v35 = vmul.f32 0.03125, %v862_v34 }
 0x919   :  { %v865_v36 = vpop.xlane.xlu1 %864 }
 0x91a   :  { %v868_v37 = vadd.f32 1e-12, %v866_v35  ;;  %v867_v38 = vmul.f32 0.03125, %v865_v36 }
 0x91c   :  { %2533 = vrsqrt.f32 %v868_v37  ;;  %v869_v39 = vadd.f32 1e-12, %v867_v38 }
 0x91e   :  { %2535 = vrsqrt.f32 %v869_v39 }
 0x926   :  { %v2534_v40 = vpop.eup %2533 }
 0x927   :  { %v872_v42 = vmul.f32 %v2534_v40, %v856_v28 }
 0x928   :  { %v2536_v43 = vpop.eup %2535 }
 0x929   :  { %v880_v44 = vmul.f32 %v2101_v41, %v872_v42  ;;  %v873_v45 = vmul.f32 %v2536_v43, %v857_v30  ;;  %v2501_v43 = vld [vmem:[%s3167_s29 + $0x10] sm:$0xff]  }
 0x92b   :  { %v881_v47 = vmul.f32 %v2101_v41, %v873_v45  ;;  %v888_v48 = vadd.f32 %v2102_v46, %v880_v44  ;;  %v2502_v44 = vld [vmem:[%s3167_s29 + $0x18] sm:$0xff]  }
 0x92d   :  { %v889_v49 = vadd.f32 %v2102_v46, %v881_v47 }
 0x92f   :  { %v890_v51 = vpack.c.bf16 %v889_v49, %v888_v48 }
 0x931   :  { %2353 = vmatmul.mubr.msk.bf16.vlgmr.msra.gmra.mrb[16].mxu0 %vm191_vm4, %v890_v51 }
 0x932   :  { %2372 = vmatprep.mubr.msk.bf16.mxu0 %vm2577_vm5, %v2576_v9  ;;  %2369 = vmatpush3.bf16.msra.mxu0 %v2501_v43 }
 0x933   :  { %2370 = vmatprep.subr.bf16.mxu0 %v2576_v9 }
 0x936   :  { %2371 = vmatpush3.bf16.msra.mxu0 %v2502_v44 }
 0x937   :  { %2376 = vmatprep.subr.bf16.mxu0 %v2576_v9 }
 0xa04   :  { %v951_v57 = vpop.f32.mrb[16].mxu0 }
 0xa05   :  { %v952_v58 = vadd.f32 %v2103_v56, %v951_v57  ;;  %v2354_v59 = vpop.f32.mrb[17].mxu0 }
 0xa06   :  { %v954_v60 = vpop.f32.mrb[18].mxu0 }
 0xa07   :  { %v960_v61 = vmul.f32 0.044715, %v952_v58  ;;  %v955_v62 = vadd.f32 %v2103_v56, %v954_v60  ;;  %v2355_v63 = vpop.f32.mrb[19].mxu0  ;;  %v958_v19 = vmul.f32 0.5, %v952_v58 }
 0xa08   :  { %v2120_v63 = vld [vmem:[%s3141_s7 + $0x1] ss:$0 sm:$0xff] }
 0xa09   :  { %v962_v0 = vmul.f32 %v960_v61, %v952_v58  ;;  %v961_v1 = vmul.f32 0.044715, %v955_v62  ;;  %v959_v20 = vmul.f32 0.5, %v955_v62 }
 0xa0b   :  { %v964_v4 = vmul.f32 %v962_v0, %v952_v58  ;;  %v963_v5 = vmul.f32 %v961_v1, %v955_v62 }
 0xa0d   :  { %v966_v6 = vadd.f32 %v964_v4, %v952_v58  ;;  %v965_v8 = vmul.f32 %v963_v5, %v955_v62  ;;  %v2114_v58 = vld [vmem:[%s3151_s17] ss:$0 sm:$0xff] }
 0xa0f   :  { %v968_v10 = vmul.f32 0.7978846, %v966_v6  ;;  %v967_v13 = vadd.f32 %v965_v8, %v955_v62 }
 0xa11   :  { %2537 = vtanh.f32 %v968_v10  ;;  %v969_v14 = vmul.f32 0.7978846, %v967_v13 }
 0xa13   :  { %2539 = vtanh.f32 %v969_v14 }
 0xa1b   :  { %v2538_v16 = vpop.eup %2537 }
 0xa1c   :  { %v972_v17 = vadd.f32 1.0, %v2538_v16 }
 0xa1d   :  { %v2540_v18 = vpop.eup %2539 }
 0xa1e   :  { %v973_v21 = vadd.f32 1.0, %v2540_v18  ;;  %v974_v23 = vmul.f32 %v972_v17, %v958_v19 }
 0xa20   :  { %v975_v24 = vmul.f32 %v973_v21, %v959_v20 }
 0xa22   :  { %v976_v7 = vpack.c.bf16 %v975_v24, %v974_v23 }
 0xa24   :  { %2365 = vmatmul.mubr.msk.bf16.vlgmr.msra.gmra.mrb[28].mxu1 %vm1016_vm11, %v976_v7 }
 0xa25   :  { %2384 = vmatprep.mubr.msk.bf16.mxu1 %vm2577_vm5, %v2576_v9 }
 0xaf7   :  { %v1054_v26 = vpop.f32.mrb[28].mxu1 }
 0xaf8   :  { %v1055_v27 = vadd.f32 %v2107_v25, %v1054_v26  ;;  %v2366_v28 = vpop.f32.mrb[29].mxu1 }
 0xaf9   :  { %v1057_v29 = vpop.f32.mrb[30].mxu1 }
 0xafa   :  { %v1058_v30 = vadd.f32 %v2107_v25, %v1057_v29  ;;  %v2367_v31 = vpop.f32.mrb[31].mxu1  ;;  %v1061_v32 = vadd.f32 %v1055_v27, %v888_v48 }
 0xafc   :  { %v1065_v11 = vsel %vm191_vm4, %v1061_v32, 0.0  ;;  %v1062_v2 = vadd.f32 %v1058_v30, %v889_v49 }
 0xafd   :  { %1066 = vadd.xlane.f32.xlu0 %v1065_v11 }
 0xafe   :  { %v1068_v3 = vsel %vm191_vm4, %v1062_v2, 0.0 }
 0xaff   :  { %1069 = vadd.xlane.f32.xlu1 %v1068_v3 }
 0xb8a   :  { %v1067_v33 = vpop.xlane.xlu0 %1066 }
 0xb8b   :  { %v1071_v34 = vmul.f32 0.03125, %v1067_v33 }
 0xb8c   :  { %v1070_v35 = vpop.xlane.xlu1 %1069 }
 0xb8d   :  { %v1073_v36 = vsub.f32 %v1061_v32, %v1071_v34  ;;  %v1072_v37 = vmul.f32 0.03125, %v1070_v35 }
 0xb8f   :  { %v1074_v38 = vsub.f32 %v1062_v2, %v1072_v37  ;;  %v1075_v39 = vmul.f32 %v1073_v36, %v1073_v36 }
 0xb91   :  { %v1077_v40 = vsel %vm191_vm4, %v1075_v39, 0.0  ;;  %v1076_v41 = vmul.f32 %v1074_v38, %v1074_v38 }
 0xb92   :  { %1078 = vadd.xlane.f32.xlu0 %v1077_v40 }
 0xb93   :  { %v1080_v42 = vsel %vm191_vm4, %v1076_v41, 0.0 }
 0xb94   :  { %1081 = vadd.xlane.f32.xlu1 %v1080_v42 }
 0xc1f   :  { %v1079_v45 = vpop.xlane.xlu0 %1078 }
 0xc20   :  { %v1083_v46 = vmul.f32 0.03125, %v1079_v45 }
 0xc21   :  { %v1082_v47 = vpop.xlane.xlu1 %1081 }
 0xc22   :  { %v1085_v48 = vadd.f32 1e-12, %v1083_v46  ;;  %v1084_v49 = vmul.f32 0.03125, %v1082_v47 }
 0xc24   :  { %2541 = vrsqrt.f32 %v1085_v48  ;;  %v1086_v51 = vadd.f32 1e-12, %v1084_v49 }
 0xc26   :  { %2543 = vrsqrt.f32 %v1086_v51 }
 0xc2e   :  { %v2542_v52 = vpop.eup %2541 }
 0xc2f   :  { %v1089_v54 = vmul.f32 %v2542_v52, %v1073_v36 }
 0xc30   :  { %v2544_v55 = vpop.eup %2543 }
 0xc31   :  { %v1097_v56 = vmul.f32 %v2113_v53, %v1089_v54  ;;  %v1090_v57 = vmul.f32 %v2544_v55, %v1074_v38 }
 0xc33   :  { %v1098_v59 = vmul.f32 %v2113_v53, %v1090_v57  ;;  %v2956_v60 = vadd.f32 %v2114_v58, %v1097_v56 }
 0xc35   :  { %v2958_v61 = vadd.f32 %v2114_v58, %v1098_v59 }
 0xc37   :  { %v1107_v62 = vpack.c.bf16 %v2958_v61, %v2956_v60 }
 0xc39   :  { %2373 = vmatmul.mubr.msk.bf16.vlgmr.msra.gmra.mrb[20].mxu0 %vm191_vm4, %v1107_v62 }
 0xc3a   :  { %2378 = vmatprep.mubr.msk.bf16.mxu0 %vm2577_vm5, %v2576_v9 }
 0xd0c   :  { %v1170_v0 = vpop.f32.mrb[20].mxu0 }
 0xd0d   :  { %v2968_v1 = vadd.f32 %v2120_v63, %v1170_v0  ;;  %v2374_v4 = vpop.f32.mrb[21].mxu0 }
 0xd0e   :  { %v1173_v5 = vpop.f32.mrb[22].mxu0 }
 0xd0f   :  { %v2970_v6 = vadd.f32 %v2120_v63, %v1173_v5  ;;  %v2375_v8 = vpop.f32.mrb[23].mxu0  ;;  %v1189_v10 = vpack.c.bf16 %v2968_v1, %v2968_v1  ;;  %v1177_v19 = vmul.f32 %v2968_v1, %v2796_v15  ;;  %v1179_v24 = vmul.f32 %v2968_v1, %v2804_v22 }
 0xd10   :  { %v1181_v43 = vmul.f32 %v2968_v1, %v2832_v50 }
 0xd11   :  { %1192 = vrot.lane.b32.xlu0 %v1189_v10, %s2579_s5  ;;  %v1190_v13 = vpack.c.bf16 %v2970_v6, %v2970_v6  ;;  %v1178_v20 = vmul.f32 %v2970_v6, %v2796_v15  ;;  %v1185_v21 = vpack.c.bf16 %v1177_v19, %v1177_v19  ;;  %v1180_v15 = vmul.f32 %v2970_v6, %v2804_v22 }
 0xd12   :  { %v1187_v7 = vpack.c.bf16 %v1179_v24, %v1179_v24  ;;  %v1182_v42 = vmul.f32 %v2970_v6, %v2832_v50  ;;  %v1423_v45 = vpack.c.bf16 %v1181_v43, %v1181_v43 }
 0xd13   :  { %1241 = vrot.lane.b32.xlu1 %v1190_v13, %s2579_s5  ;;  %v1186_v23 = vpack.c.bf16 %v1178_v20, %v1178_v20  ;;  %v1188_v25 = vpack.c.bf16 %v1180_v15, %v1180_v15 }
 0xd14   :  { %v1424_v44 = vpack.c.bf16 %v1182_v42, %v1182_v42 }
 0xd83   :  { %v1193_v14 = vpop.permute.xlu0 %1192 }
 0xd84   :  { %v1198_v16 = vsel %vm191_vm4, %v1193_v14, 0 }
 0xd85   :  { %2377 = vmatpush3.bf16.xpose.msra.mxu0 %v1198_v16  ;;  %v1242_v17 = vpop.permute.xlu1 %1241 }
 0xd86   :  { %v1247_v18 = vsel %vm191_vm4, %v1242_v17, 0  ;;  %2388 = vmatprep.subr.bf16.mxu0 %v2576_v9  ;;  %v1183_v17 = vmul.f32 %v2968_v1, %v2842_v12 }
 0xd87   :  { %2383 = vmatpush3.bf16.xpose.msra.mxu1 %v1247_v18 }
 0xd88   :  { %2394 = vmatprep.subr.bf16.mxu1 %v2576_v9  ;;  %v1425_v19 = vpack.c.bf16 %v1183_v17, %v1183_v17 }
 0xd8c   :  { %2379 = vmatmul.mubr.msk.bf16.vlgmr.msra.gmra.mrb[24].mxu0 %vm191_vm4, %v1185_v21 }
 0xd8d   :  { %2389 = vmatpush3.bf16.xpose.msra.mxu0 %v1198_v16  ;;  %2390 = vmatprep.mubr.msk.bf16.mxu0 %vm2577_vm5, %v2576_v9 }
 0xd8e   :  { %2385 = vmatmul.mubr.msk.bf16.vlgmr.msra.gmra.mrb[32].mxu1 %vm191_vm4, %v1186_v23  ;;  %2400 = vmatprep.subr.bf16.mxu0 %v2576_v9 }
 0xd8f   :  { %2395 = vmatpush3.bf16.xpose.msra.mxu1 %v1247_v18  ;;  %2396 = vmatprep.mubr.msk.bf16.mxu1 %vm2577_vm5, %v2576_v9  ;;  %v1184_v18 = vmul.f32 %v2970_v6, %v2842_v12 }
 0xd90   :  { %2406 = vmatprep.subr.bf16.mxu1 %v2576_v9 }
 0xd91   :  { %v1426_v20 = vpack.c.bf16 %v1184_v18, %v1184_v18 }
 0xd94   :  { %2391 = vmatmul.mubr.msk.bf16.vlgmr.msra.gmra.mrb[28].mxu0 %vm191_vm4, %v1187_v7 }
 0xd95   :  { %2402 = vmatprep.mubr.msk.bf16.mxu0 %vm2577_vm5, %v2576_v9 }
 0xd96   :  { %2397 = vmatmul.mubr.msk.bf16.vlgmr.msra.gmra.mrb[36].mxu1 %vm191_vm4, %v1188_v25 }
 0xd97   :  { %2408 = vmatprep.mubr.msk.bf16.mxu1 %vm2577_vm5, %v2576_v9 }
 0xe5f   :  { %v1234_v26 = vpop.f32.mrb[24].mxu0 }
 0xe60   :  { %v2380_v27 = vpop.f32.mrb[25].mxu0  ;;  %v1375_v28 = vsel %vm521_vm10, %v1234_v26, -inf }
 0xe61   :  { %1376 = vmax.xlane.f32.xlu1 %v1375_v28  ;;  %v1237_v22 = vpop.f32.mrb[26].mxu0  ;;  %v1283_v29 = vpop.f32.mrb[32].mxu1 }
 0xe62   :  { %v2381_v30 = vpop.f32.mrb[27].mxu0  ;;  %v2386_v31 = vpop.f32.mrb[33].mxu1  ;;  %v1378_v32 = vsel %vm521_vm10, %v1283_v29, -inf }
 0xe63   :  { %1379 = vmax.xlane.f32.xlu0 %v1378_v32  ;;  %v1286_v11 = vpop.f32.mrb[34].mxu1 }
 0xe64   :  { %v2387_v2 = vpop.f32.mrb[35].mxu1 }
 0xe67   :  { %v1326_v3 = vpop.f32.mrb[28].mxu0 }
 0xe68   :  { %v2392_v33 = vpop.f32.mrb[29].mxu0  ;;  %v1381_v34 = vsel %vm521_vm10, %v1326_v3, -inf }
 0xe69   :  { %v1329_v35 = vpop.f32.mrb[30].mxu0  ;;  %1382 = vmax.xlane.f32.xlu0 %v1381_v34  ;;  %v1369_v36 = vpop.f32.mrb[36].mxu1  ;;  %v2503_v33 = vld [vmem:[%s3142_s8 + $0x10] sm:$0xff]   ;;  %v2504_v34 = vld [vmem:[%s3142_s8 + $0x18] sm:$0xff]  }
 0xe6a   :  { %v2393_v37 = vpop.f32.mrb[31].mxu0  ;;  %v2398_v38 = vpop.f32.mrb[37].mxu1  ;;  %v1384_v39 = vsel %vm521_vm10, %v1369_v36, -inf }
 0xe6b   :  { %1385 = vmax.xlane.f32.xlu1 %v1384_v39  ;;  %v1372_v40 = vpop.f32.mrb[38].mxu1 }
 0xe6c   :  { %v2399_v41 = vpop.f32.mrb[39].mxu1 }
 0xe7c   :  { %1477 = vrot.lane.b32.xlu1 %v1424_v44, %s2578_s21 }
 0xe7f   :  { %1428 = vrot.lane.b32.xlu0 %v1423_v45, %s2578_s21 }
 0xeee   :  { %v1377_v46 = vpop.xlane.xlu1 %1376 }
 0xeef   :  { %v1387_v47 = vsub.f32 %v1234_v26, %v1377_v46 }
 0xef0   :  { %v1380_v48 = vpop.xlane.xlu0 %1379 }
 0xef1   :  { %v1391_v49 = vmul.f32 1.442695, %v1387_v47  ;;  %v1388_v51 = vsub.f32 %v1283_v29, %v1380_v48 }
 0xef3   :  { %2545 = vpow2.f32 %v1391_v49  ;;  %v1393_v52 = vmul.f32 1.442695, %v1388_v51 }
 0xef5   :  { %2547 = vpow2.f32 %v1393_v52 }
 0xef6   :  { %v1383_v53 = vpop.xlane.xlu0 %1382 }
 0xef7   :  { %v1389_v54 = vsub.f32 %v1326_v3, %v1383_v53 }
 0xef8   :  { %v1386_v55 = vpop.xlane.xlu1 %1385 }
 0xef9   :  { %v1395_v56 = vmul.f32 1.442695, %v1389_v54  ;;  %v1390_v57 = vsub.f32 %v1369_v36, %v1386_v55 }
 0xefa   :  { %v1429_v50 = vpop.permute.xlu0 %1428 }
 0xefb   :  { %2549 = vpow2.f32 %v1395_v56  ;;  %v1397_v58 = vmul.f32 1.442695, %v1390_v57  ;;  %v1434_v59 = vsel %vm104_vm0, %v1429_v50, 0 }
 0xefc   :  { %2401 = vmatpush3.bf16.msra.mxu0 %v1434_v59  ;;  %v1478_v62 = vpop.permute.xlu1 %1477 }
 0xefd   :  { %v2546_v63 = vpop.eup %2545  ;;  %2551 = vpow2.f32 %v1397_v58  ;;  %v1483_v0 = vsel %vm104_vm0, %v1478_v62, 0  ;;  %2412 = vmatprep.subr.bf16.mxu0 %v2576_v9  ;;  %v2137_v58 = vld [vmem:[%s3143_s9 + $0x1] ss:$0 sm:$0xff] }
 0xefe   :  { %2407 = vmatpush3.bf16.msra.mxu1 %v1483_v0  ;;  %v1399_v4 = vsel %vm521_vm10, %v2546_v63, 0.0 }
 0xeff   :  { %v2548_v5 = vpop.eup %2547  ;;  %1400 = vadd.xlane.f32.xlu0 %v1399_v4  ;;  %2418 = vmatprep.subr.bf16.mxu1 %v2576_v9 }
 0xf00   :  { %v1402_v8 = vsel %vm521_vm10, %v2548_v5, 0.0 }
 0xf01   :  { %1403 = vadd.xlane.f32.xlu1 %v1402_v8 }
 0xf05   :  { %v2550_v10 = vpop.eup %2549 }
 0xf06   :  { %v1405_v13 = vsel %vm521_vm10, %v2550_v10, 0.0 }
 0xf07   :  { %v2552_v14 = vpop.eup %2551  ;;  %1406 = vadd.xlane.f32.xlu0 %v1405_v13 }
 0xf08   :  { %v1408_v16 = vsel %vm521_vm10, %v2552_v14, 0.0 }
 0xf09   :  { %1409 = vadd.xlane.f32.xlu1 %v1408_v16 }
 0xf1a   :  { %1526 = vrot.lane.b32.xlu1 %v1425_v19, %s2578_s21 }
 0xf1d   :  { %1575 = vrot.lane.b32.xlu0 %v1426_v20, %s2578_s21 }
 0xf8c   :  { %v1401_v21 = vpop.xlane.xlu0 %1400 }
 0xf8d   :  { %2553 = vrcp.f32 %v1401_v21 }
 0xf8e   :  { %v1404_v23 = vpop.xlane.xlu1 %1403 }
 0xf8f   :  { %2555 = vrcp.f32 %v1404_v23 }
 0xf94   :  { %v1407_v24 = vpop.xlane.xlu0 %1406 }
 0xf95   :  { %2557 = vrcp.f32 %v1407_v24 }
 0xf96   :  { %v1410_v15 = vpop.xlane.xlu1 %1409 }
 0xf97   :  { %v2554_v7 = vpop.eup %2553  ;;  %2559 = vrcp.f32 %v1410_v15 }
 0xf98   :  { %v1415_v25 = vmul.f32 %v2554_v7, %v2546_v63  ;;  %v1576_v6 = vpop.permute.xlu0 %1575  ;;  %v2506_v7 = vld [vmem:[%s3144_s12 + $0x18] sm:$0xff]  }
 0xf99   :  { %v2556_v1 = vpop.eup %2555  ;;  %v1581_v29 = vsel %vm104_vm0, %v1576_v6, 0 }
 0xf9a   :  { %v1416_v26 = vmul.f32 %v2556_v1, %v2548_v5  ;;  %v1527_v27 = vpop.permute.xlu1 %1526  ;;  %v1419_v12 = vpack.c.bf16 %v1415_v25, %v1415_v25 }
 0xf9b   :  { %v1532_v28 = vsel %vm104_vm0, %v1527_v27, 0 }
 0xf9c   :  { %2403 = vmatmul.mubr.msk.bf16.vlgmr.msra.gmra.mrb[32].mxu0 %vm521_vm10, %v1419_v12  ;;  %v1420_v22 = vpack.c.bf16 %v1416_v26, %v1416_v26 }
 0xf9d   :  { %2413 = vmatpush3.bf16.msra.mxu0 %v1532_v28  ;;  %2414 = vmatprep.mubr.msk.bf16.mxu0 %vm2577_vm5, %v2576_v9 }
 0xf9e   :  { %2409 = vmatmul.mubr.msk.bf16.vlgmr.msra.gmra.mrb[40].mxu1 %vm521_vm10, %v1420_v22  ;;  %2424 = vmatprep.subr.bf16.mxu0 %v2576_v9  ;;  %v2143_v22 = vld [vmem:[%s3145_s10 + $0x1] ss:$0 sm:$0xff] }
 0xf9f   :  { %v2558_v30 = vpop.eup %2557  ;;  %2419 = vmatpush3.bf16.msra.mxu1 %v1581_v29  ;;  %2420 = vmatprep.mubr.msk.bf16.mxu1 %vm2577_vm5, %v2576_v9 }
 0xfa0   :  { %v1417_v31 = vmul.f32 %v2558_v30, %v2550_v10  ;;  %2432 = vmatprep.subr.bf16.mxu1 %v2576_v9 }
 0xfa1   :  { %v2560_v32 = vpop.eup %2559 }
 0xfa2   :  { %v1418_v11 = vmul.f32 %v2560_v32, %v2552_v14  ;;  %v1421_v2 = vpack.c.bf16 %v1417_v31, %v1417_v31 }
 0xfa4   :  { %2415 = vmatmul.mubr.msk.bf16.vlgmr.msra.gmra.mrb[36].mxu0 %vm521_vm10, %v1421_v2  ;;  %v1422_v3 = vpack.c.bf16 %v1418_v11, %v1418_v11  ;;  %v2144_v11 = vld [vmem:[%s3146_s11 + $0x1] ss:$0 sm:$0xff] }
 0xfa5   :  { %2428 = vmatprep.mubr.msk.bf16.mxu0 %vm2577_vm5, %v2576_v9  ;;  %2425 = vmatpush3.bf16.msra.mxu0 %v2503_v33 }
 0xfa6   :  { %2421 = vmatmul.mubr.msk.bf16.vlgmr.msra.gmra.mrb[44].mxu1 %vm521_vm10, %v1422_v3  ;;  %2426 = vmatprep.subr.bf16.mxu0 %v2576_v9 }
 0xfa7   :  { %2436 = vmatprep.mubr.msk.bf16.mxu1 %vm2577_vm5, %v2576_v9 }
 0xfa9   :  { %2427 = vmatpush3.bf16.msra.mxu0 %v2504_v34 }
 0xfaa   :  { %2440 = vmatprep.subr.bf16.mxu0 %v2576_v9 }
0x106f   :  { %v1470_v35 = vpop.f32.mrb[32].mxu0 }
0x1070   :  { %v2404_v36 = vpop.f32.mrb[33].mxu0  ;;  %v1623_v44 = vsel %vm191_vm4, %v1470_v35, 0.0  ;;  %v2507_v35 = vld [vmem:[%s3147_s14 + $0x20] sm:$0xff]  }
0x1071   :  { %v1473_v37 = vpop.f32.mrb[34].mxu0  ;;  %v1519_v38 = vpop.f32.mrb[40].mxu1  ;;  %v2508_v36 = vld [vmem:[%s3147_s14 + $0x28] sm:$0xff]  }
0x1072   :  { %v2405_v39 = vpop.f32.mrb[35].mxu0  ;;  %v2410_v40 = vpop.f32.mrb[41].mxu1  ;;  %v1626_v51 = vsel %vm191_vm4, %v1519_v38, 0.0  ;;  %v2509_v37 = vld [vmem:[%s3147_s14 + $0x30] sm:$0xff]   ;;  %v2510_v38 = vld [vmem:[%s3147_s14 + $0x38] sm:$0xff]  }
0x1073   :  { %v1522_v41 = vpop.f32.mrb[42].mxu1  ;;  %v2150_v39 = vld [vmem:[%s3148_s13 + $0x1] ss:$0 sm:$0xff] }
0x1074   :  { %v2411_v42 = vpop.f32.mrb[43].mxu1 }
0x1077   :  { %v1568_v43 = vpop.f32.mrb[36].mxu0 }
0x1078   :  { %v1624_v45 = vsel %vm191_vm4, %v1568_v43, 0.0  ;;  %v2416_v46 = vpop.f32.mrb[37].mxu0 }
0x1079   :  { %v1625_v47 = vadd.f32 %v1624_v45, %v1623_v44  ;;  %v1571_v48 = vpop.f32.mrb[38].mxu0  ;;  %v1617_v49 = vpop.f32.mrb[44].mxu1 }
0x107a   :  { %v1627_v52 = vsel %vm191_vm4, %v1617_v49, 0.0  ;;  %v2417_v53 = vpop.f32.mrb[39].mxu0  ;;  %v2422_v54 = vpop.f32.mrb[45].mxu1 }
0x107b   :  { %v1628_v55 = vadd.f32 %v1627_v52, %v1626_v51  ;;  %v1620_v56 = vpop.f32.mrb[46].mxu1 }
0x107c   :  { %v2423_v57 = vpop.f32.mrb[47].mxu1 }
0x107d   :  { %v1629_v50 = vpack.c.bf16 %v1628_v55, %v1625_v47 }
0x107f   :  { %2429 = vmatmul.mubr.msk.bf16.vlgmr.msra.gmra.mrb[40].mxu0 %vm191_vm4, %v1629_v50 }
0x1080   :  { %2448 = vmatprep.mubr.msk.bf16.mxu0 %vm2577_vm5, %v2576_v9  ;;  %2441 = vmatpush3.bf16.msra.mxu0 %v2507_v35 }
0x1081   :  { %2442 = vmatprep.subr.bf16.mxu0 %v2576_v9 }
0x1084   :  { %2443 = vmatpush3.bf16.msra.mxu0 %v2508_v36 }
0x1085   :  { %2444 = vmatprep.subr.bf16.mxu0 %v2576_v9 }
0x1088   :  { %2445 = vmatpush3.bf16.msra.mxu0 %v2509_v37 }
0x1089   :  { %2446 = vmatprep.subr.bf16.mxu0 %v2576_v9 }
0x108c   :  { %2447 = vmatpush3.bf16.msra.mxu0 %v2510_v38 }
0x1152   :  { %v1692_v59 = vpop.f32.mrb[40].mxu0 }
0x1153   :  { %v1693_v62 = vadd.f32 %v2137_v58, %v1692_v59  ;;  %v2430_v63 = vpop.f32.mrb[41].mxu0 }
0x1154   :  { %v1695_v0 = vpop.f32.mrb[42].mxu0 }
0x1155   :  { %v1696_v4 = vadd.f32 %v2137_v58, %v1695_v0  ;;  %v2431_v5 = vpop.f32.mrb[43].mxu0  ;;  %v1699_v8 = vadd.f32 %v1693_v62, %v2956_v60 }
0x1157   :  { %v1705_v10 = vsel %vm191_vm4, %v1699_v8, 0.0  ;;  %v1700_v13 = vadd.f32 %v1696_v4, %v2958_v61  ;;  %v2505_v61 = vld [vmem:[%s3144_s12 + $0x10] sm:$0xff]  }
0x1158   :  { %1706 = vadd.xlane.f32.xlu1 %v1705_v10  ;;  %2433 = vmatpush3.bf16.msra.mxu1 %v2505_v61 }
0x1159   :  { %v1708_v14 = vsel %vm191_vm4, %v1700_v13, 0.0  ;;  %2434 = vmatprep.subr.bf16.mxu1 %v2576_v9 }
0x115a   :  { %1709 = vadd.xlane.f32.xlu0 %v1708_v14 }
0x115c   :  { %2435 = vmatpush3.bf16.msra.mxu1 %v2506_v7 }
0x115d   :  { %2452 = vmatprep.subr.bf16.mxu1 %v2576_v9 }
0x11e5   :  { %v1707_v16 = vpop.xlane.xlu1 %1706 }
0x11e6   :  { %v1711_v17 = vmul.f32 0.03125, %v1707_v16 }
0x11e7   :  { %v1710_v18 = vpop.xlane.xlu0 %1709 }
0x11e8   :  { %v1713_v19 = vsub.f32 %v1699_v8, %v1711_v17  ;;  %v1712_v20 = vmul.f32 0.03125, %v1710_v18  ;;  %v2163_v8 = vld [vmem:[%s3149_s15 + $0x1] ss:$0 sm:$0xff] }
0x11ea   :  { %v1714_v21 = vsub.f32 %v1700_v13, %v1712_v20  ;;  %v1715_v23 = vmul.f32 %v1713_v19, %v1713_v19 }
0x11ec   :  { %v1717_v24 = vsel %vm191_vm4, %v1715_v23, 0.0  ;;  %v1716_v15 = vmul.f32 %v1714_v21, %v1714_v21 }
0x11ed   :  { %1718 = vadd.xlane.f32.xlu0 %v1717_v24 }
0x11ee   :  { %v1720_v60 = vsel %vm191_vm4, %v1716_v15, 0.0 }
0x11ef   :  { %1721 = vadd.xlane.f32.xlu1 %v1720_v60 }
0x127a   :  { %v1719_v25 = vpop.xlane.xlu0 %1718 }
0x127b   :  { %v1723_v1 = vmul.f32 0.03125, %v1719_v25 }
0x127c   :  { %v1722_v26 = vpop.xlane.xlu1 %1721 }
0x127d   :  { %v1725_v27 = vadd.f32 1e-12, %v1723_v1  ;;  %v1724_v12 = vmul.f32 0.03125, %v1722_v26 }
0x127f   :  { %2561 = vrsqrt.f32 %v1725_v27  ;;  %v1726_v6 = vadd.f32 1e-12, %v1724_v12 }
0x1281   :  { %2563 = vrsqrt.f32 %v1726_v6  ;;  %v2511_v6 = vld [vmem:[%s3152_s18] sm:$0xff]  }
0x1289   :  { %v2562_v28 = vpop.eup %2561 }
0x128a   :  { %v1729_v29 = vmul.f32 %v2562_v28, %v1713_v19  ;;  %v2512_v28 = vld [vmem:[%s3152_s18 + $0x8] sm:$0xff]  }
0x128b   :  { %v2564_v30 = vpop.eup %2563 }
0x128c   :  { %v1737_v31 = vmul.f32 %v2143_v22, %v1729_v29  ;;  %v1730_v32 = vmul.f32 %v2564_v30, %v1714_v21 }
0x128e   :  { %v1738_v2 = vmul.f32 %v2143_v22, %v1730_v32  ;;  %v1745_v3 = vadd.f32 %v2144_v11, %v1737_v31 }
0x1290   :  { %v1746_v33 = vadd.f32 %v2144_v11, %v1738_v2 }
0x1292   :  { %v1747_v34 = vpack.c.bf16 %v1746_v33, %v1745_v3 }
0x1294   :  { %2437 = vmatmul.mubr.msk.bf16.vlgmr.msra.gmra.mrb[48].mxu1 %vm191_vm4, %v1747_v34 }
0x1295   :  { %2456 = vmatprep.mubr.msk.bf16.mxu1 %vm2577_vm5, %v2576_v9  ;;  %2453 = vmatpush3.bf16.msra.mxu1 %v2511_v6 }
0x1296   :  { %2454 = vmatprep.subr.bf16.mxu1 %v2576_v9  ;;  %v2172_v9 = vld [vmem:[%s3151_s17 + $0x1] ss:$0 sm:$0xff] }
0x1299   :  { %2455 = vmatpush3.bf16.msra.mxu1 %v2512_v28 }
0x1367   :  { %v1810_v40 = vpop.f32.mrb[48].mxu1 }
0x1368   :  { %v1811_v41 = vadd.f32 %v2150_v39, %v1810_v40  ;;  %v2438_v42 = vpop.f32.mrb[49].mxu1 }
0x1369   :  { %v1813_v43 = vpop.f32.mrb[50].mxu1 }
0x136a   :  { %v1819_v44 = vmul.f32 0.044715, %v1811_v41  ;;  %v1814_v45 = vadd.f32 %v2150_v39, %v1813_v43  ;;  %v2439_v46 = vpop.f32.mrb[51].mxu1  ;;  %v1817_v59 = vmul.f32 0.5, %v1811_v41 }
0x136c   :  { %v1821_v47 = vmul.f32 %v1819_v44, %v1811_v41  ;;  %v1820_v48 = vmul.f32 0.044715, %v1814_v45  ;;  %v1818_v62 = vmul.f32 0.5, %v1814_v45 }
0x136e   :  { %v1823_v49 = vmul.f32 %v1821_v47, %v1811_v41  ;;  %v1822_v51 = vmul.f32 %v1820_v48, %v1814_v45 }
0x1370   :  { %v1825_v52 = vadd.f32 %v1823_v49, %v1811_v41  ;;  %v1824_v53 = vmul.f32 %v1822_v51, %v1814_v45 }
0x1372   :  { %v1827_v54 = vmul.f32 0.7978846, %v1825_v52  ;;  %v1826_v55 = vadd.f32 %v1824_v53, %v1814_v45 }
0x1374   :  { %2565 = vtanh.f32 %v1827_v54  ;;  %v1828_v56 = vmul.f32 0.7978846, %v1826_v55 }
0x1376   :  { %2567 = vtanh.f32 %v1828_v56 }
0x137e   :  { %v2566_v57 = vpop.eup %2565 }
0x137f   :  { %v1831_v50 = vadd.f32 1.0, %v2566_v57 }
0x1380   :  { %v2568_v58 = vpop.eup %2567 }
0x1381   :  { %v1832_v63 = vadd.f32 1.0, %v2568_v58  ;;  %v1833_v0 = vmul.f32 %v1831_v50, %v1817_v59 }
0x1383   :  { %v1834_v4 = vmul.f32 %v1832_v63, %v1818_v62 }
0x1385   :  { %v1835_v5 = vpack.c.bf16 %v1834_v4, %v1833_v0  ;;  %v2173_v0 = vld [vmem:[%s3153_s19] ss:$0 sm:$0xff] }
0x1387   :  { %2449 = vmatmul.mubr.msk.bf16.vlgmr.msra.gmra.mrb[44].mxu0 %vm1016_vm11, %v1835_v5 }
0x145a   :  { %v1914_v10 = vpop.f32.mrb[44].mxu0 }
0x145b   :  { %v1915_v13 = vadd.f32 %v2163_v8, %v1914_v10  ;;  %v2450_v14 = vpop.f32.mrb[45].mxu0 }
0x145c   :  { %v1917_v16 = vpop.f32.mrb[46].mxu0 }
0x145d   :  { %v1918_v17 = vadd.f32 %v2163_v8, %v1917_v16  ;;  %v2451_v18 = vpop.f32.mrb[47].mxu0  ;;  %v1921_v19 = vadd.f32 %v1915_v13, %v1745_v3  ;;  %v2171_v3 = vld [vmem:[%s3150_s16 + $0x1] ss:$0 sm:$0xff] }
0x145f   :  { %v1927_v20 = vsel %vm191_vm4, %v1921_v19, 0.0  ;;  %v1922_v21 = vadd.f32 %v1918_v17, %v1746_v33 }
0x1460   :  { %1928 = vadd.xlane.f32.xlu1 %v1927_v20 }
0x1461   :  { %v1930_v23 = vsel %vm191_vm4, %v1922_v21, 0.0 }
0x1462   :  { %1931 = vadd.xlane.f32.xlu0 %v1930_v23 }
0x14ed   :  { %v1929_v24 = vpop.xlane.xlu1 %1928 }
0x14ee   :  { %v1933_v15 = vmul.f32 0.03125, %v1929_v24 }
0x14ef   :  { %v1932_v60 = vpop.xlane.xlu0 %1931 }
0x14f0   :  { %v1935_v61 = vsub.f32 %v1921_v19, %v1933_v15  ;;  %v1934_v7 = vmul.f32 0.03125, %v1932_v60 }
0x14f2   :  { %v1936_v25 = vsub.f32 %v1922_v21, %v1934_v7  ;;  %v1937_v1 = vmul.f32 %v1935_v61, %v1935_v61 }
0x14f4   :  { %v1939_v26 = vsel %vm191_vm4, %v1937_v1, 0.0  ;;  %v1938_v27 = vmul.f32 %v1936_v25, %v1936_v25 }
0x14f5   :  { %1940 = vadd.xlane.f32.xlu1 %v1939_v26 }
0x14f6   :  { %v1942_v12 = vsel %vm191_vm4, %v1938_v27, 0.0 }
0x14f7   :  { %1943 = vadd.xlane.f32.xlu0 %v1942_v12 }
0x1582   :  { %v1941_v22 = vpop.xlane.xlu1 %1940 }
0x1583   :  { %v1945_v29 = vmul.f32 0.03125, %v1941_v22 }
0x1584   :  { %v1944_v30 = vpop.xlane.xlu0 %1943 }
0x1585   :  { %v1947_v31 = vadd.f32 1e-12, %v1945_v29  ;;  %v1946_v32 = vmul.f32 0.03125, %v1944_v30 }
0x1587   :  { %2569 = vrsqrt.f32 %v1947_v31  ;;  %v1948_v11 = vadd.f32 1e-12, %v1946_v32 }
0x1589   :  { %2571 = vrsqrt.f32 %v1948_v11 }
0x1591   :  { %v2570_v2 = vpop.eup %2569 }
0x1592   :  { %v1951_v33 = vmul.f32 %v2570_v2, %v1935_v61 }
0x1593   :  { %v2572_v34 = vpop.eup %2571 }
0x1594   :  { %v1959_v35 = vmul.f32 %v2171_v3, %v1951_v33  ;;  %v1952_v36 = vmul.f32 %v2572_v34, %v1936_v25 }
0x1596   :  { %v1967_v37 = vadd.f32 %v2172_v9, %v1959_v35  ;;  %v1960_v38 = vmul.f32 %v2171_v3, %v1952_v36 }
0x1598   :  { %v1968_v39 = vadd.f32 %v2172_v9, %v1960_v38  ;;  %v1969_v40 = vsel %vm191_vm4, %v1967_v37, 0.0  ;;  %v1983_v42 = vpack.c.bf16 %v1967_v37, %v1967_v37 }
0x1599   :  { %v1970_v41 = vrot.slane %v1969_v40, 4 }
0x159a   :  { %v1984_v43 = vpack.c.bf16 %v1968_v39, %v1968_v39  ;;  %v1976_v44 = vsel %vm191_vm4, %v1968_v39, 0.0  ;;  %v1998_v51 = vunpack.c.l.b16 %v1983_v42 }
0x159b   :  { %v1971_v45 = vadd.f32 %v1970_v41, %v1969_v40  ;;  %v1977_v46 = vrot.slane %v1976_v44, 4 }
0x159c   :  { %v1999_v47 = vunpack.c.l.b16 %v1984_v43 }
0x159d   :  { %v1972_v48 = vrot.slane %v1971_v45, 2  ;;  %v1978_v49 = vadd.f32 %v1977_v46, %v1976_v44 }
0x159e   :  { %v2000_v52 = vrot.slane %v1999_v47, 7 }
0x159f   :  { %v1973_v53 = vadd.f32 %v1972_v48, %v1971_v45  ;;  %v1979_v54 = vrot.slane %v1978_v49, 2 }
0x15a0   :  { %v2002_v55 = vsel %vm2001_vm12, %v2000_v52, %v1998_v51 }
0x15a1   :  { %v2003_v56 = vpack.c.b16 %v2002_v55, %v2002_v55  ;;  %v1974_v57 = vrot.slane %v1973_v53, 1  ;;  %v1980_v50 = vadd.f32 %v1979_v54, %v1978_v49 }
0x15a3   :  { %2457 = vmatmul.mubr.msk.bf16.vlgmr.msra.gmra.mrb[52].mxu1 %vm191_vm4, %v2003_v56  ;;  %v1981_v58 = vrot.slane %v1980_v50, 1  ;;  %v1975_v59 = vadd.f32 %v1974_v57, %v1973_v53 }
0x15a5   :  { %v1982_v62 = vadd.f32 %v1981_v58, %v1980_v50 }
0x15a7   :  { %v2062_v63 = vsel %vm2001_vm12, %v1982_v62, %v1975_v59 }
0x1676   :  { %v2053_v4 = vpop.f32.mrb[52].mxu1 }
0x1677   :  { %v2054_v5 = vadd.f32 %v2173_v0, %v2053_v4  ;;  %v2458_v8 = vpop.f32.mrb[53].mxu1 }
0x1678   :  { %v2056_v10 = vpop.f32.mrb[54].mxu1 }
0x1679   :  { %2573 = vtanh.f32 %v2054_v5  ;;  %v2459_v13 = vpop.f32.mrb[55].mxu1 }
0x1683   :  { %v2574_v14 = vpop.eup %2573 }
0x1684   :  { %2065 = vrot.lane.b32.xlu0 %v2574_v14, %s2580_s22 }
0x16f6   :  { %v2066_v16 = vpop.permute.xlu0 %2065 }
0x16f7   :  { %v2068_v17 = vsel %vm191_vm4, %v2062_v63, %v2066_v16 }
0x16f8   :  { %2070 = vst.msk [vmem:[%s3154_s20] sm:$0x3] %vm2069_vm13, %v2068_v17 }

</bundles_post_ra>
